<compile_context>
chip_gen: v7x
topology: tpu7x:2x2x1
jax: 0.10.0
libtpu: 0.0.40
codegen_flags: <defaults>
</compile_context>

<pallas_src>
import functools

import numpy as np
import jax
import jax.numpy as jnp
from jax.experimental import pallas as pl
from jax.experimental.pallas import tpu as pltpu


# ----------------------------------------------------------------------------- helpers
def _gelu_tanh(x):
    c0 = jnp.float32(0.7978845608028654)  # sqrt(2/pi)
    return 0.5 * x * (1.0 + jnp.tanh(c0 * (x + jnp.float32(0.044715) * x * x * x)))


def bn_scale_shift(bn, eps=1e-5):
    scale = bn["gamma"] / jnp.sqrt(bn["var"] + eps)
    shift = bn["beta"] - bn["mean"] * scale
    return scale, shift


def _spatial_conv_matrix(wsp, H, W):
    """Dense matrices for the 7x7 / padding-3 conv on a row-major flattened (H, W) map.

    wsp: (1, 2, 7, 7) OIHW conv weight.  Returns (Ka, Km), each (S, S) f32, so that
    conv_flat = Ka @ avg_flat + Km @ max_flat (column vectors, S = H*W).
    """
    w = np.asarray(wsp, np.float32)
    S = H * W
    K = np.zeros((2, S, S), np.float32)
    for p in range(S):
        r, c = divmod(p, W)
        for ki in range(7):
            rr = r + ki - 3
            if rr < 0 or rr >= H:
                continue
            for kj in range(7):
                cc = c + kj - 3
                if cc < 0 or cc >= W:
                    continue
                q = rr * W + cc
                K[0, p, q] += w[0, 0, ki, kj]
                K[1, p, q] += w[0, 1, ki, kj]
    return jnp.asarray(K[0]), jnp.asarray(K[1])


# ----------------------------------------------------------------------------- kernel 1
def _attention_pool_kernel(x_ref, w1t_ref, b1_ref, w2t_ref, b2_ref,
                           ka_ref, km_ref, bsp_ref, h_ref):
    """LesionAttentionModule + spatial mean-pool for ONE batch element.

    x_ref: (1, S, C) channel-last feature map.  h_ref: (1, 1, C) lane-dense output.
    """
    x = x_ref[0].astype(jnp.float32)                         # (S, C)
    C = x.shape[1]

    # ---- channel attention: shared 1x1-conv MLP on stacked [avg; max] pooled rows
    avg_p = jnp.mean(x, axis=0, keepdims=True)               # (1, C)
    max_p = jnp.max(x, axis=0, keepdims=True)                # (1, C)
    row0 = jax.lax.broadcasted_iota(jnp.int32, (2, C), 0) == 0
    pooled = jnp.where(row0, avg_p, max_p)                   # (2, C): row0=avg, row1=max
    mid = jnp.maximum(
        jnp.dot(pooled, w1t_ref[...], preferred_element_type=jnp.float32) + b1_ref[...],
        0.0)                                                 # (2, C//8)
    outs = jnp.dot(mid, w2t_ref[...], preferred_element_type=jnp.float32) + b2_ref[...]
    ch_att = jax.nn.sigmoid(jnp.sum(outs, axis=0, keepdims=True))   # (1, C)
    x_ch = x * ch_att                                        # (S, C)

    # ---- spatial attention: 7x7 conv expressed as two dense (S, S) matvecs (MXU)
    avg_sp = jnp.mean(x_ch, axis=1, keepdims=True)           # (S, 1)
    max_sp = jnp.max(x_ch, axis=1, keepdims=True)            # (S, 1)
    conv = (jnp.dot(ka_ref[...], avg_sp, preferred_element_type=jnp.float32)
            + jnp.dot(km_ref[...], max_sp, preferred_element_type=jnp.float32)
            + bsp_ref[0])                                    # (S, 1)
    sp_att = jax.nn.sigmoid(conv)                            # (S, 1)

    # ---- global average pool over spatial positions (lane-dense (1, C) result)
    h_ref[...] = jnp.mean(x_ch * sp_att, axis=0, keepdims=True)[None]


def lesion_attention_pool(feats, prep):
    """feats: (B, C, H, W) backbone feature map (f32 or bf16) -> pooled h: (B, C) f32."""
    B, C, H, W = feats.shape
    S = H * W
    C8 = prep["att_w1t"].shape[1]
    # channel-last, lane-dense layout for the kernel (layout plumbing done by XLA).
    x = jnp.transpose(feats, (0, 2, 3, 1)).reshape(B, S, C)

    h3 = pl.pallas_call(
        _attention_pool_kernel,
        out_shape=jax.ShapeDtypeStruct((B, 1, C), jnp.float32),
        grid=(B,),
        in_specs=[
            pl.BlockSpec((1, S, C), lambda b: (b, 0, 0)),
            pl.BlockSpec((C, C8), lambda b: (0, 0)),
            pl.BlockSpec((1, C8), lambda b: (0, 0)),
            pl.BlockSpec((C8, C), lambda b: (0, 0)),
            pl.BlockSpec((1, C), lambda b: (0, 0)),
            pl.BlockSpec((S, S), lambda b: (0, 0)),
            pl.BlockSpec((S, S), lambda b: (0, 0)),
            pl.BlockSpec(memory_space=pltpu.MemorySpace.SMEM),   # conv bias (1,)
        ],
        out_specs=pl.BlockSpec((1, 1, C), lambda b: (b, 0, 0)),
        compiler_params=pltpu.CompilerParams(dimension_semantics=("parallel",)),
    )(x, prep["att_w1t"], prep["att_b1"], prep["att_w2t"], prep["att_b2"],
      prep["att_Ka"], prep["att_Km"], prep["att_bsp"])
    return h3[:, 0, :]


# ----------------------------------------------------------------------------- kernel 2
def _heads_kernel(h_ref, w1f_ref, b1f_ref,
                  cw2_ref, cb2_ref, cw3_ref, cb3_ref,
                  gw2_ref, gb2_ref, gw3_ref, gb3_ref,
                  ow2_ref, ob2_ref, dw2_ref, db2_ref,
                  logits_ref, grade_ref, ord_ref, dom_ref, *, widths):
    """classifier / grade_predictor / ordinal_encoder / domain_classifier heads.

    BatchNorm1d folded into the Linear weights, Dropout = identity (eval),
    four first-layer Linears fused into one wide matmul, bf16 weights + f32 accum.
    """
    h = h_ref[...].astype(jnp.float32)                       # (B, F)

    def linear(x, w_ref, b_ref):
        return (jnp.dot(x, w_ref[...].astype(jnp.float32),
                        preferred_element_type=jnp.float32)
                + b_ref[...].astype(jnp.float32))

    z1 = linear(h, w1f_ref, b1f_ref)                         # (B, n_c+n_g+n_o+n_d)
    n_c, n_g, n_o, _ = widths
    i1, i2, i3 = n_c, n_c + n_g, n_c + n_g + n_o

    # classifier: [Linear-BN-GELU-Dropout] x2 + Linear
    c = _gelu_tanh(z1[:, :i1])
    c = _gelu_tanh(linear(c, cw2_ref, cb2_ref))
    logits_ref[...] = linear(c, cw3_ref, cb3_ref)

    # grade_head.grade_predictor
    g = _gelu_tanh(z1[:, i1:i2])
    g = _gelu_tanh(linear(g, gw2_ref, gb2_ref))
    grade_ref[...] = linear(g, gw3_ref, gb3_ref)

    # grade_head.ordinal_encoder (Linear-GELU-Linear, no BN)
    o = _gelu_tanh(z1[:, i2:i3])
    ord_ref[...] = linear(o, ow2_ref, ob2_ref)

    # domain_classifier (GradientReversal forward = identity)
    d = jnp.maximum(z1[:, i3:], 0.0)
    dom_ref[...] = linear(d, dw2_ref, db2_ref)


def run_heads(h, prep):
    B = h.shape[0]
    nc = prep["num_classes"]
    widths = prep["head_widths"]
    args = (h, prep["w1f"], prep["b1f"],
            prep["c2_wt"], prep["c2_b"], prep["c3_wt"], prep["c3_b"],
            prep["g2_wt"], prep["g2_b"], prep["g3_wt"], prep["g3_b"],
            prep["o2_wt"], prep["o2_b"], prep["d2_wt"], prep["d2_b"])
    # Explicit VMEM budget (v7x: 64 MiB physical / 32 MiB scoped default).
    operand_bytes = sum(int(a.size) * a.dtype.itemsize for a in args)
    operand_bytes += B * (3 * nc - 1 + 5) * 4
    vmem_limit = int(min(60 * 2**20, max(16 * 2**20, 2 * operand_bytes + (4 << 20))))
    # TODO(synk): for very large feature_dim / batch, grid this kernel over the hidden
    #   dimension (Buffered weight blocks) and over B instead of keeping all weights
    #   resident in a single invocation.
    return pl.pallas_call(
        functools.partial(_heads_kernel, widths=widths),
        out_shape=(jax.ShapeDtypeStruct((B, nc), jnp.float32),
                   jax.ShapeDtypeStruct((B, nc), jnp.float32),
                   jax.ShapeDtypeStruct((B, nc - 1), jnp.float32),
                   jax.ShapeDtypeStruct((B, 5), jnp.float32)),
        compiler_params=pltpu.CompilerParams(vmem_limit_bytes=vmem_limit),
    )(*args)


# ----------------------------------------------------------------------------- forward
def enhanced_dr_classifier_forward(feats, prep, alpha=0.0):
    """Mirrors EnhancedDRClassifier.forward for the default call signature.

    feats stands in for backbone.forward_features(x); returns
    (logits, (grade_logits, ordinal_thresholds), domain_logits-or-None).
    """
    h = lesion_attention_pool(feats, prep)                    # Pallas kernel 1
    logits, grade_logits, ordinal, dom = run_heads(h, prep)   # Pallas kernel 2
    return logits, (grade_logits, ordinal), (dom if alpha > 0 else None)


# ----------------------------------------------------------------------------- params
def init_params(key, feature_dim, num_classes=5):
    ks = iter(jax.random.split(key, 32))

    def nrm(shape, std):
        return (std * jax.random.normal(next(ks), shape)).astype(jnp.float32)

    def kaiming_fan_out(out_f, in_f):  # nn.init.kaiming_normal_(mode='fan_out', relu)
        return nrm((out_f, in_f), (2.0 / out_f) ** 0.5)

    def bn_default(n):  # fresh BatchNorm1d: gamma=1, beta=0, running mean 0 / var 1
        return {"gamma": jnp.ones((n,), jnp.float32), "beta": jnp.zeros((n,), jnp.float32),
                "mean": jnp.zeros((n,), jnp.float32), "var": jnp.ones((n,), jnp.float32)}

    C, C8 = feature_dim, feature_dim // 8
    p = {}
    # LesionAttentionModule (PyTorch default inits approximated, deterministic)
    p["att_w1"] = nrm((C8, C), (1.0 / C) ** 0.5)
    p["att_b1"] = nrm((C8,), 0.05)
    p["att_w2"] = nrm((C, C8), (1.0 / C8) ** 0.5)
    p["att_b2"] = nrm((C,), 0.05)
    p["att_wsp"] = nrm((1, 2, 7, 7), (1.0 / (2 * 49)) ** 0.5)
    p["att_bsp"] = nrm((1,), 0.05)
    # classifier
    p["c1_w"] = kaiming_fan_out(1024, C);          p["c1_b"] = jnp.zeros((1024,), jnp.float32)
    p["c2_w"] = kaiming_fan_out(512, 1024);        p["c2_b"] = jnp.zeros((512,), jnp.float32)
    p["c3_w"] = kaiming_fan_out(num_classes, 512); p["c3_b"] = jnp.zeros((num_classes,), jnp.float32)
    p["bn_c1"] = bn_default(1024); p["bn_c2"] = bn_default(512)
    # grade_head.grade_predictor
    p["g1_w"] = kaiming_fan_out(512, C);           p["g1_b"] = jnp.zeros((512,), jnp.float32)
    p["g2_w"] = kaiming_fan_out(256, 512);         p["g2_b"] = jnp.zeros((256,), jnp.float32)
    p["g3_w"] = kaiming_fan_out(num_classes, 256); p["g3_b"] = jnp.zeros((num_classes,), jnp.float32)
    p["bn_g1"] = bn_default(512); p["bn_g2"] = bn_default(256)
    # grade_head.ordinal_encoder (default PyTorch Linear init approximated)
    p["o1_w"] = nrm((256, C), (1.0 / C) ** 0.5);   p["o1_b"] = nrm((256,), 0.05)
    p["o2_w"] = nrm((num_classes - 1, 256), (1.0 / 256) ** 0.5)
    p["o2_b"] = nrm((num_classes - 1,), 0.05)
    # domain_classifier
    p["d1_w"] = kaiming_fan_out(256, C);           p["d1_b"] = jnp.zeros((256,), jnp.float32)
    p["d2_w"] = kaiming_fan_out(5, 256);           p["d2_b"] = jnp.zeros((5,), jnp.float32)
    return p


def prepare_params(p, H, W, head_dtype=jnp.bfloat16, bn_eps=1e-5):
    """One-time parameter prep: transposes, BN folding, first-layer fusion, dtype cast."""
    f32 = jnp.float32

    def fold(w, b, bn):   # Linear followed by BatchNorm1d (eval) -> folded (in,out)/(1,out)
        s, t = bn_scale_shift(bn, bn_eps)
        return (w.T * s[None, :]).astype(f32), (b * s + t).reshape(1, -1).astype(f32)

    def plain(w, b):
        return w.T.astype(f32), b.reshape(1, -1).astype(f32)

    prep = {}
    # LesionAttentionModule (kept f32: small next to the feature-map stream)
    prep["att_w1t"] = p["att_w1"].T.astype(f32)               # (C, C//8)
    prep["att_b1"] = p["att_b1"].reshape(1, -1).astype(f32)
    prep["att_w2t"] = p["att_w2"].T.astype(f32)               # (C//8, C)
    prep["att_b2"] = p["att_b2"].reshape(1, -1).astype(f32)
    prep["att_Ka"], prep["att_Km"] = _spatial_conv_matrix(p["att_wsp"], H, W)
    prep["att_bsp"] = p["att_bsp"].astype(f32)                # (1,) -> SMEM scalar

    # heads: fold BN, transpose, fuse the four first layers, cast weights to head_dtype
    c1w, c1b = fold(p["c1_w"], p["c1_b"], p["bn_c1"])
    g1w, g1b = fold(p["g1_w"], p["g1_b"], p["bn_g1"])
    o1w, o1b = plain(p["o1_w"], p["o1_b"])
    d1w, d1b = plain(p["d1_w"], p["d1_b"])
    prep["head_widths"] = tuple(int(w.shape[1]) for w in (c1w, g1w, o1w, d1w))
    prep["w1f"] = jnp.concatenate([c1w, g1w, o1w, d1w], axis=1).astype(head_dtype)
    prep["b1f"] = jnp.concatenate([c1b, g1b, o1b, d1b], axis=1).astype(f32)

    c2w, c2b = fold(p["c2_w"], p["c2_b"], p["bn_c2"])
    g2w, g2b = fold(p["g2_w"], p["g2_b"], p["bn_g2"])
    prep["c2_wt"], prep["c2_b"] = c2w.astype(head_dtype), c2b
    prep["g2_wt"], prep["g2_b"] = g2w.astype(head_dtype), g2b
    for name in ("c3", "g3", "o2", "d2"):
        wt, bb = plain(p[name + "_w"], p[name + "_b"])
        prep[name + "_wt"], prep[name + "_b"] = wt.astype(head_dtype), bb
    prep["num_classes"] = int(p["c3_w"].shape[0])
    return prep


# ----------------------------------------------------------------------------- pure-JAX reference
def reference_forward(feats, p):
    """Mirror of the PyTorch module (eval mode) from the raw parameters, f32."""
    hp = jax.lax.Precision.HIGHEST
    B, C, H, W = feats.shape
    x = feats.reshape(B, C, H * W)
    avg_p = x.mean(axis=2)
    max_p = x.max(axis=2)

    def cmlp(v):
        mid = jax.nn.relu(jnp.dot(v, p["att_w1"].T, precision=hp) + p["att_b1"])
        return jnp.dot(mid, p["att_w2"].T, precision=hp) + p["att_b2"]

    ch_att = jax.nn.sigmoid(cmlp(avg_p) + cmlp(max_p))
    x_ch = feats * ch_att[:, :, None, None]
    sp_in = jnp.concatenate([x_ch.mean(axis=1, keepdims=True),
                             x_ch.max(axis=1, keepdims=True)], axis=1)
    conv = jax.lax.conv_general_dilated(
        sp_in, p["att_wsp"], (1, 1), ((3, 3), (3, 3)),
        dimension_numbers=("NCHW", "OIHW", "NCHW"), precision=hp) + p["att_bsp"][0]
    sp_att = jax.nn.sigmoid(conv)
    h = (x_ch * sp_att).mean(axis=(2, 3))

    def lin(v, w, b):
        return jnp.dot(v, w.T, precision=hp) + b

    cs1, ct1 = bn_scale_shift(p["bn_c1"]); cs2, ct2 = bn_scale_shift(p["bn_c2"])
    gs1, gt1 = bn_scale_shift(p["bn_g1"]); gs2, gt2 = bn_scale_shift(p["bn_g2"])
    z = _gelu_tanh(lin(h, p["c1_w"], p["c1_b"]) * cs1 + ct1)
    z = _gelu_tanh(lin(z, p["c2_w"], p["c2_b"]) * cs2 + ct2)
    logits = lin(z, p["c3_w"], p["c3_b"])
    g = _gelu_tanh(lin(h, p["g1_w"], p["g1_b"]) * gs1 + gt1)
    g = _gelu_tanh(lin(g, p["g2_w"], p["g2_b"]) * gs2 + gt2)
    grade = lin(g, p["g3_w"], p["g3_b"])
    o = _gelu_tanh(lin(h, p["o1_w"], p["o1_b"]))
    ordinal = lin(o, p["o2_w"], p["o2_b"])
    d = jax.nn.relu(lin(h, p["d1_w"], p["d1_b"]))
    dom = lin(d, p["d2_w"], p["d2_b"])
    return logits, grade, ordinal, dom


# ----------------------------------------------------------------------------- main
if __name__ == "__main__":
    B, FDIM, H, W = 2, 32, 16, 16          # small synthetic backbone feature map
    key = jax.random.PRNGKey(0)
    kf, kp = jax.random.split(key)
    feats = jax.random.normal(kf, (B, FDIM, H, W), jnp.float32)
    params = init_params(kp, FDIM, num_classes=5)

    # --- numerically strict path: f32 weights, checked against the raw-param reference
    prep32 = prepare_params(params, H, W, head_dtype=jnp.float32)
    logits, (grade_logits, ordinal), dom_none = enhanced_dr_classifier_forward(
        feats, prep32, alpha=0.0)
    assert dom_none is None                      # alpha = 0 -> no domain logits
    _, _, dom = enhanced_dr_classifier_forward(feats, prep32, alpha=0.5)
    jax.block_until_ready((logits, grade_logits, ordinal, dom))

    r_logits, r_grade, r_ord, r_dom = reference_forward(feats, params)
    np.testing.assert_allclose(np.asarray(logits), np.asarray(r_logits), rtol=2e-3, atol=1e-4)
    np.testing.assert_allclose(np.asarray(grade_logits), np.asarray(r_grade), rtol=2e-3, atol=1e-4)
    np.testing.assert_allclose(np.asarray(ordinal), np.asarray(r_ord), rtol=2e-3, atol=1e-4)
    np.testing.assert_allclose(np.asarray(dom), np.asarray(r_dom), rtol=2e-3, atol=1e-4)

    # --- performance path: bf16 head weights + bf16 feature stream (f32 accumulation)
    prep_bf16 = prepare_params(params, H, W)     # default head_dtype = bf16
    l_bf, (g_bf, o_bf), d_bf = enhanced_dr_classifier_forward(
        feats.astype(jnp.bfloat16), prep_bf16, alpha=0.5)
    jax.block_until_ready((l_bf, g_bf, o_bf, d_bf))
    for a in (l_bf, g_bf, o_bf, d_bf):
        assert bool(jnp.all(jnp.isfinite(a)))

    print("KERNEL_OK")
</pallas_src>

<mosaic_0001>
module attributes {stable_mosaic.version = 11 : i64} {
  func.func @_attention_pool_kernel(%arg0: i32, %arg1: memref<1x256x32xf32, #tpu.memory_space<vmem>>, %arg2: memref<32x4xf32, #tpu.memory_space<vmem>>, %arg3: memref<1x4xf32, #tpu.memory_space<vmem>>, %arg4: memref<4x32xf32, #tpu.memory_space<vmem>>, %arg5: memref<1x32xf32, #tpu.memory_space<vmem>>, %arg6: memref<256x256xf32, #tpu.memory_space<vmem>>, %arg7: memref<256x256xf32, #tpu.memory_space<vmem>>, %arg8: memref<1xf32, #tpu.memory_space<smem>>, %arg9: memref<1x1x32xf32, #tpu.memory_space<vmem>>) attributes {dimension_semantics = [#tpu.dimension_semantics<parallel>], iteration_bounds = array<i64: 2>, scalar_prefetch = 0 : i64, scratch_operands = 0 : i64, tpu.core_type = #tpu.core_type<tc>, window_params = [{transform_indices = @transform_0, window_bounds = array<i64: 1, 256, 32>}, {pipeline_mode = #tpu.pipeline_mode<synchronous>, transform_indices = @transform_1, window_bounds = array<i64: 32, 4>}, {pipeline_mode = #tpu.pipeline_mode<synchronous>, transform_indices = @transform_2, window_bounds = array<i64: 1, 4>}, {pipeline_mode = #tpu.pipeline_mode<synchronous>, transform_indices = @transform_3, window_bounds = array<i64: 4, 32>}, {pipeline_mode = #tpu.pipeline_mode<synchronous>, transform_indices = @transform_4, window_bounds = array<i64: 1, 32>}, {pipeline_mode = #tpu.pipeline_mode<synchronous>, transform_indices = @transform_5, window_bounds = array<i64: 256, 256>}, {pipeline_mode = #tpu.pipeline_mode<synchronous>, transform_indices = @transform_6, window_bounds = array<i64: 256, 256>}, {transform_indices = @transform_7, window_bounds = array<i64: 1>}, {transform_indices = @transform_8, window_bounds = array<i64: 1, 1, 32>}]} {
    %c0 = arith.constant 0 : index
    %c0_0 = arith.constant 0 : index
    %c0_1 = arith.constant 0 : index
    %0 = vector.load %arg1[%c0, %c0_0, %c0_1] : memref<1x256x32xf32, #tpu.memory_space<vmem>>, vector<1x256x32xf32>
    %1 = vector.shape_cast %0 : vector<1x256x32xf32> to vector<256x32xf32>
    %cst = arith.constant dense<0.000000e+00> : vector<32xf32>
    %2 = vector.multi_reduction <add>, %1, %cst [0] : vector<256x32xf32> to vector<32xf32>
    %3 = vector.shape_cast %2 : vector<32xf32> to vector<1x32xf32>
    %cst_2 = arith.constant 2.560000e+02 : f32
    %4 = vector.broadcast %cst_2 : f32 to vector<1x32xf32>
    %5 = arith.divf %3, %4 : vector<1x32xf32>
    %cst_3 = arith.constant dense<0xFF800000> : vector<32xf32>
    %6 = vector.multi_reduction <maximumf>, %1, %cst_3 [0] : vector<256x32xf32> to vector<32xf32>
    %7 = vector.shape_cast %6 : vector<32xf32> to vector<1x32xf32>
    %8 = tpu.iota {dimensions = array<i32: 0>} : vector<2x32xi32>
    %c0_i32 = arith.constant 0 : i32
    %9 = vector.broadcast %c0_i32 : i32 to vector<2x32xi32>
    %10 = arith.cmpi eq, %8, %9 : vector<2x32xi32>
    %11 = vector.shape_cast %5 : vector<1x32xf32> to vector<1x32xf32>
    %12 = vector.broadcast %11 : vector<1x32xf32> to vector<2x32xf32>
    %13 = vector.shape_cast %7 : vector<1x32xf32> to vector<1x32xf32>
    %14 = vector.broadcast %13 : vector<1x32xf32> to vector<2x32xf32>
    %15 = arith.select %10, %12, %14 : vector<2x32xi1>, vector<2x32xf32>
    %c0_4 = arith.constant 0 : index
    %c0_5 = arith.constant 0 : index
    %16 = vector.load %arg2[%c0_4, %c0_5] : memref<32x4xf32, #tpu.memory_space<vmem>>, vector<32x4xf32>
    %cst_6 = arith.constant dense<0.000000e+00> : vector<2x4xf32>
    %17 = tpu.matmul %15, %16, %cst_6 {dimension_numbers = #tpu.dot_dimension_numbers<[1], [0], [0], [1], [0, 0, 1, 1], [], []>} : vector<2x32xf32>, vector<32x4xf32>, vector<2x4xf32> -> vector<2x4xf32>
    %c0_7 = arith.constant 0 : index
    %c0_8 = arith.constant 0 : index
    %18 = vector.load %arg3[%c0_7, %c0_8] : memref<1x4xf32, #tpu.memory_space<vmem>>, vector<1x4xf32>
    %19 = vector.broadcast %18 : vector<1x4xf32> to vector<2x4xf32>
    %20 = arith.addf %17, %19 : vector<2x4xf32>
    %cst_9 = arith.constant 0.000000e+00 : f32
    %21 = vector.broadcast %cst_9 : f32 to vector<2x4xf32>
    %22 = arith.maximumf %20, %21 : vector<2x4xf32>
    %c0_10 = arith.constant 0 : index
    %c0_11 = arith.constant 0 : index
    %23 = vector.load %arg4[%c0_10, %c0_11] : memref<4x32xf32, #tpu.memory_space<vmem>>, vector<4x32xf32>
    %cst_12 = arith.constant dense<0.000000e+00> : vector<2x32xf32>
    %24 = tpu.matmul %22, %23, %cst_12 {dimension_numbers = #tpu.dot_dimension_numbers<[1], [0], [0], [1], [0, 0, 1, 1], [], []>} : vector<2x4xf32>, vector<4x32xf32>, vector<2x32xf32> -> vector<2x32xf32>
    %c0_13 = arith.constant 0 : index
    %c0_14 = arith.constant 0 : index
    %25 = vector.load %arg5[%c0_13, %c0_14] : memref<1x32xf32, #tpu.memory_space<vmem>>, vector<1x32xf32>
    %26 = vector.broadcast %25 : vector<1x32xf32> to vector<2x32xf32>
    %27 = arith.addf %24, %26 : vector<2x32xf32>
    %cst_15 = arith.constant dense<0.000000e+00> : vector<32xf32>
    %28 = vector.multi_reduction <add>, %27, %cst_15 [0] : vector<2x32xf32> to vector<32xf32>
    %29 = vector.shape_cast %28 : vector<32xf32> to vector<1x32xf32>
    %30 = arith.negf %29 : vector<1x32xf32>
    %31 = math.exp %30 : vector<1x32xf32>
    %cst_16 = arith.constant 1.000000e+00 : f32
    %32 = vector.broadcast %cst_16 : f32 to vector<1x32xf32>
    %33 = arith.addf %32, %31 : vector<1x32xf32>
    %34 = arith.divf %32, %33 : vector<1x32xf32>
    %35 = vector.broadcast %34 : vector<1x32xf32> to vector<256x32xf32>
    %36 = arith.mulf %1, %35 : vector<256x32xf32>
    %cst_17 = arith.constant dense<0.000000e+00> : vector<256xf32>
    %37 = vector.multi_reduction <add>, %36, %cst_17 [1] : vector<256x32xf32> to vector<256xf32>
    %38 = vector.shape_cast %37 : vector<256xf32> to vector<256x1xf32>
    %cst_18 = arith.constant 3.200000e+01 : f32
    %39 = vector.broadcast %cst_18 : f32 to vector<256x1xf32>
    %40 = arith.divf %38, %39 : vector<256x1xf32>
    %cst_19 = arith.constant dense<0xFF800000> : vector<256xf32>
    %41 = vector.multi_reduction <maximumf>, %36, %cst_19 [1] : vector<256x32xf32> to vector<256xf32>
    %42 = vector.shape_cast %41 : vector<256xf32> to vector<256x1xf32>
    %c0_20 = arith.constant 0 : index
    %c0_21 = arith.constant 0 : index
    %43 = vector.load %arg6[%c0_20, %c0_21] : memref<256x256xf32, #tpu.memory_space<vmem>>, vector<256x256xf32>
    %cst_22 = arith.constant dense<0.000000e+00> : vector<256x1xf32>
    %44 = tpu.matmul %43, %40, %cst_22 {dimension_numbers = #tpu.dot_dimension_numbers<[1], [0], [0], [1], [0, 0, 1, 1], [], []>} : vector<256x256xf32>, vector<256x1xf32>, vector<256x1xf32> -> vector<256x1xf32>
    %c0_23 = arith.constant 0 : index
    %c0_24 = arith.constant 0 : index
    %45 = vector.load %arg7[%c0_23, %c0_24] : memref<256x256xf32, #tpu.memory_space<vmem>>, vector<256x256xf32>
    %cst_25 = arith.constant dense<0.000000e+00> : vector<256x1xf32>
    %46 = tpu.matmul %45, %42, %cst_25 {dimension_numbers = #tpu.dot_dimension_numbers<[1], [0], [0], [1], [0, 0, 1, 1], [], []>} : vector<256x256xf32>, vector<256x1xf32>, vector<256x1xf32> -> vector<256x1xf32>
    %47 = arith.addf %44, %46 : vector<256x1xf32>
    %c0_26 = arith.constant 0 : index
    %48 = memref.load %arg8[%c0_26] : memref<1xf32, #tpu.memory_space<smem>>
    %49 = vector.broadcast %48 : f32 to vector<256x1xf32>
    %50 = arith.addf %47, %49 : vector<256x1xf32>
    %51 = arith.negf %50 : vector<256x1xf32>
    %52 = math.exp %51 : vector<256x1xf32>
    %cst_27 = arith.constant 1.000000e+00 : f32
    %53 = vector.broadcast %cst_27 : f32 to vector<256x1xf32>
    %54 = arith.addf %53, %52 : vector<256x1xf32>
    %55 = arith.divf %53, %54 : vector<256x1xf32>
    %56 = vector.broadcast %55 : vector<256x1xf32> to vector<256x32xf32>
    %57 = arith.mulf %36, %56 : vector<256x32xf32>
    %cst_28 = arith.constant dense<0.000000e+00> : vector<32xf32>
    %58 = vector.multi_reduction <add>, %57, %cst_28 [0] : vector<256x32xf32> to vector<32xf32>
    %59 = vector.shape_cast %58 : vector<32xf32> to vector<1x32xf32>
    %cst_29 = arith.constant 2.560000e+02 : f32
    %60 = vector.broadcast %cst_29 : f32 to vector<1x32xf32>
    %61 = arith.divf %59, %60 : vector<1x32xf32>
    %62 = vector.shape_cast %61 : vector<1x32xf32> to vector<1x1x32xf32>
    %c0_30 = arith.constant 0 : index
    %c0_31 = arith.constant 0 : index
    %c0_32 = arith.constant 0 : index
    %63 = vector.load %arg9[%c0_30, %c0_31, %c0_32] : memref<1x1x32xf32, #tpu.memory_space<vmem>>, vector<1x1x32xf32>
    tpu.vector_store %arg9[%c0_30, %c0_31, %c0_32], %62 {strides = array<i32>} : memref<1x1x32xf32, #tpu.memory_space<vmem>>, vector<1x1x32xf32>,
    return
  }
  func.func @transform_0(%arg0: i32) -> (i32, i32, i32) {
    %c0_i32 = arith.constant 0 : i32
    %c0_i32_0 = arith.constant 0 : i32
    %c0_i32_1 = arith.constant 0 : i32
    return %arg0, %c0_i32, %c0_i32_0 : i32, i32, i32
  }
  func.func @transform_1(%arg0: i32) -> (i32, i32) {
    %c0_i32 = arith.constant 0 : i32
    %c0_i32_0 = arith.constant 0 : i32
    %c0_i32_1 = arith.constant 0 : i32
    return %c0_i32, %c0_i32_0 : i32, i32
  }
  func.func @transform_2(%arg0: i32) -> (i32, i32) {
    %c0_i32 = arith.constant 0 : i32
    %c0_i32_0 = arith.constant 0 : i32
    %c0_i32_1 = arith.constant 0 : i32
    return %c0_i32, %c0_i32_0 : i32, i32
  }
  func.func @transform_3(%arg0: i32) -> (i32, i32) {
    %c0_i32 = arith.constant 0 : i32
    %c0_i32_0 = arith.constant 0 : i32
    %c0_i32_1 = arith.constant 0 : i32
    return %c0_i32, %c0_i32_0 : i32, i32
  }
  func.func @transform_4(%arg0: i32) -> (i32, i32) {
    %c0_i32 = arith.constant 0 : i32
    %c0_i32_0 = arith.constant 0 : i32
    %c0_i32_1 = arith.constant 0 : i32
    return %c0_i32, %c0_i32_0 : i32, i32
  }
  func.func @transform_5(%arg0: i32) -> (i32, i32) {
    %c0_i32 = arith.constant 0 : i32
    %c0_i32_0 = arith.constant 0 : i32
    %c0_i32_1 = arith.constant 0 : i32
    return %c0_i32, %c0_i32_0 : i32, i32
  }
  func.func @transform_6(%arg0: i32) -> (i32, i32) {
    %c0_i32 = arith.constant 0 : i32
    %c0_i32_0 = arith.constant 0 : i32
    %c0_i32_1 = arith.constant 0 : i32
    return %c0_i32, %c0_i32_0 : i32, i32
  }
  func.func @transform_7(%arg0: i32) -> i32 {
    %c0_i32 = arith.constant 0 : i32
    %c0_i32_0 = arith.constant 0 : i32
    return %c0_i32 : i32
  }
  func.func @transform_8(%arg0: i32) -> (i32, i32, i32) {
    %c0_i32 = arith.constant 0 : i32
    %c0_i32_0 = arith.constant 0 : i32
    %c0_i32_1 = arith.constant 0 : i32
    return %arg0, %c0_i32, %c0_i32_0 : i32, i32, i32
  }
}

</mosaic_0001>

<bundles_post_ra>
// kernel: tpu_custom_call.1
= control target key start
LH: loop header
LB: loop body
LE: loop exit
PB: predicated region body
PF: predicated region fallthrough
CT: control target
= control target key end

     0   :  { %s3568_s0 = inlined_call_operand.vmem [shape: f32[2,256,32], index: 0, kind: input, shape index: {}]   ;;  %s3569_s1 = inlined_call_operand.vmem [shape: f32[32,4], index: 1, kind: input, shape index: {}]   ;;  %s3570_s2 = inlined_call_operand.vmem [shape: f32[1,4], index: 2, kind: input, shape index: {}]   ;;  %s3571_s3 = inlined_call_operand.vmem [shape: f32[4,32], index: 3, kind: input, shape index: {}]   ;;  %s3572_s4 = inlined_call_operand.vmem [shape: f32[1,32], index: 4, kind: input, shape index: {}]   ;;  %s3573_s5 = inlined_call_operand.vmem [shape: f32[256,256], index: 5, kind: input, shape index: {}]   ;;  %s3574_s6 = inlined_call_operand.hbm [shape: f32[256,256], index: 6, kind: input, shape index: {}]   ;;  %s3575_s7 = inlined_call_operand.<no memory space> [shape: f32[1], index: 7, kind: input, shape index: {}]   ;;  %s3576_s8 = inlined_call_operand.hbm [shape: f32[2,1,32], index: 8, kind: output, shape index: {}]  }
   0x1   :  { %13 = sst [smem:[#allocation2]] %s3575_s7 }
   0x2   :  { %14 = vsyncpa [#allocation4], 0 }
   0x3   :  { %15 = vsyncpa [#allocation5], 0 }
   0x4   :  { %17 = vsyncpa [#allocation5 + $0x1], 0  ;;  %s2603_s29 = smov 0   ;;  %s2605_s30 = smov 0  }
   0x5   :  { %s2607_s9 = smov 0   ;;  %s2609_s10 = smov 0  }
   0x6 LB: > { %s2624_s7 = sadd.s32 4294967295, %s2545_s10   ;;  %s2086_s11 = sadd.s32 4294967294, %s2545_s10   ;;  %s2545_s10 = sphi %s2609_s10, %s3592_s10   ;;  %s2541_s9 = sphi %s2607_s9, %s3591_s9   ;;  %s2537_s30 = sphi %s2605_s30, %s3590_s30   ;;  %s2533_s29 = sphi %s2603_s29, %s3589_s29  }
   0x7   : > { %s2628_s12 = sadd.s32 1, %s2545_s10   ;;  %s203_s13 = sadd.s32 1, %s2541_s9 }
   0x8   : > { %s200_s14 = ssub.s32 %s2545_s10, %s2628_s12  ;;  %p213_p0 = scmp.ne.s32.totalorder %s2541_s9, %s2537_s30 }
   0x9   : > { %p201_p1 = scmp.eq.s32.totalorder %s200_s14, 0  ;;  %p214_p2 = scmp.eq.s32.totalorder %s2624_s7, 1 }
   0xa   : > { %p219_p3 = scmp.ne.s32.totalorder %s2537_s30, %s2533_s29  ;;  %p220_p4 = scmp.eq.s32.totalorder %s2086_s11, 1 }
   0xb   : > { %s2639_s15 = scalar_select %p201_p1, %s2541_s9, %s203_s13  }
   0xc   : > { %p2641_p5 = por %p214_p2, %p213_p0  ;;  %p2645_p6 = por %p220_p4, %p219_p3 }
   0xd   : > { %p2087_p7 = scmp.ge.s32.totalorder %s2545_s10, 1  ;;  %p227_p8 = scmp.lt.s32.totalorder %s2545_s10, 3 }
   0xe   : > { %s3580_s16 = scalar_select %p2641_p5, 1, 0 }
   0xf   : > { %s3581_s17 = scalar_select %p2645_p6, 1, 0 }
  0x10   : > { %p3577_p9 = scmp.eq.s32.totalorder %s2624_s7, 0  ;;  %p2652_p10 = pnand %p2087_p7, %p227_p8 }
  0x11   : > { %s2547_s19 = smov [#allocation3]   ;;  %s2451_s24 = scalar_lea.hbm %s3574_s6, 8192 }
  0x12   : > { %s3582_s18 = scalar_select %p2652_p10, 1, 0 }
  0x13   : > { %s254_s20 = sshll.u32 %s2547_s19, 4  ;;  %p2267_p11 = pneg %p2652_p10  ;;  %s255_s20 = int_to_ptr.vmem [resolvable:$true] %s254_s20 }
  0x14   : > { %p2452_p13 = scmp.ne.s32.totalorder %s3574_s6, %s2451_s24  ;;  %p2458_p3 = scmp.lt.u32.totalorder %s2451_s24, %s3574_s6 }
  0x15   : > { %p2660_p12 = pnand %p3577_p9, %p2267_p11 }
  0x17   : > { %p2453_p0 = pneg %p2660_p12 }
  0x19   : > { %p2454_p1 = pnand %p2453_p0, %p2452_p13 }
  0x1b   : > { %p2455_p2 = pneg %p2454_p1 }
  0x1d   : > { %p2460_p4 = pnand %p2458_p3, %p2455_p2 }
  0x1f   : > { %2463 = shalt.err (!%p2460_p4)
}
  0x20   : > { %s2464_s11 = scalar_lea.vmem %s255_s20, 8192  ;;  %p2472_p9 = scmp.lt.s32.totalorder %s255_s20, %s255_s20 }
  0x21   : > { %p2465_p7 = scmp.ne.s32.totalorder %s255_s20, %s2464_s11  ;;  %p2473_p6 = scmp.lt.s32.totalorder %s2464_s11, %s2464_s11 }
  0x23   : > { %p2467_p8 = pnand %p2465_p7, %p2453_p0  ;;  %p2474_p5 = por %p2473_p6, %p2472_p9 }
  0x25   : > { %p2468_p11 = pneg %p2467_p8 }
  0x27   : > { %p2475_p10 = pnand %p2474_p5, %p2468_p11 }
  0x29   : > { %2478 = shalt.err (!%p2475_p10)
}
  0x2a   : > { %s2548_s13 = smov 256   ;;  %s2549_s14 = smov 16  }
  0x2b   : > { %2270 = dma.hbm_to_vmem [thread:$0]  (!%p2660_p12), %s3574_s6, 8192, %s255_s20, [#allocation4], %s2548_s13, %s2548_s13, %s2549_s14  }
  0x2c   : > { %p3584_p13 = scmp.ne.s32.totalorder %s3582_s18, 0 }
  0x2d   : > { %p3585_p1 = scmp.eq.s32.totalorder (!%p3584_p13), %s2624_s7, 0 }
  0x2e   : > { %281 = sbr.rel (%p3584_p13) target bundleno = 1409 (0x581), region = 52 }
  0x35   : > { %2524 = dma.done.wait (%p3585_p1), [#allocation4], 8192   ;;  %p3586_p0 = pmov %p3585_p1 }
  0x36   : > { %p314_p5 = scmp.lt.s32.totalorder %s2624_s7, 1  ;;  %v2550_v0 = vmov 0.0|0.0   ;;  %vm2551_vm0 = vmmov 0   ;;  %v2552_v1 = vmov 0.0   ;;  %vm351_vm1 = vcmask 261120   ;;  %v496_v2 = vld [vmem:[%s3569_s1] sm:$0xff] }
  0x37   : > { %2526 = vsyncadd (%p3586_p0), [#allocation4], 4294959104  ;;  %2159 = vmatprep.subr.bf16.mxu0 %v2550_v0  ;;  %2151 = vmatprep.mubr.msk.f32.mxu0 %vm2551_vm0, %v2552_v1  ;;  %v497_v3 = vld [vmem:[%s3569_s1 + $0x8] sm:$0xff]  ;;  %v498_v4 = vld [vmem:[%s3569_s1 + $0x10] sm:$0xff]  ;;  %vm593_vm3 = vcmask 1043456   ;;  %vm589_vm4 = vcmask 31744  }
  0x38   : > { %s315_s21 = scalar_select %p314_p5, %s2624_s7, 1  ;;  %2154 = vmatprep.subr.mxu1 %v2552_v1  ;;  %2156 = vmatprep.mubr.msk.f32.mxu1 %vm2551_vm0, %v2552_v1  ;;  %v2160_v5 = vpack.c.bf16 %v497_v3, %v496_v2  ;;  %v499_v6 = vld [vmem:[%s3569_s1 + $0x18] sm:$0xff]  ;;  %vm667_vm5 = vcmask 254976   ;;  %vm2004_vm6 = vcmask 253952  }
  0x39   : > { %v2163_v13 = vpack.c.bf16 %v499_v6, %v498_v4  ;;  %s1516_s27 = sld [smem:[#allocation2]]  ;;  %s312_s28 = sand.u32 1, %s2537_s30  }
  0x3a   : > { %s2135_s18 = sshll.u32 %s315_s21, 8  ;;  %2161 = vmatpush3.bf16.msra.mxu0 %v2160_v5  ;;  %s2132_s11 = sshll.u32 %s2624_s7, 4 }
  0x3b   : > { %s2692_s24 = scalar_lea.vmem %s3568_s0, %s2135_s18  ;;  %2162 = vmatprep.subr.bf16.mxu0 %v2550_v0  ;;  %s313_s13 = scalar_lea.vmem [#allocation6], %s312_s28 }
  0x3c   : > { %v2707_v7 = vld [vmem:[%s2692_s24] sm:$0xff]  ;;  %v2710_v8 = vld [vmem:[%s2692_s24 + $0x8] sm:$0xff]  ;;  %v2713_v9 = vld [vmem:[%s2692_s24 + $0x10] sm:$0xff]  ;;  %s2019_s14 = sshll.u32 %s313_s13, 4  ;;  %s3526_s21 = scalar_lea.hbm %s3576_s8, %s2132_s11  ;;  %s3528_s14 = int_to_ptr.vmem [resolvable:$true] %s2019_s14 }
  0x3d   : > { %v2716_v10 = vld [vmem:[%s2692_s24 + $0x18] sm:$0xff]  ;;  %v352_v11 = vsel %vm351_vm1, %v2707_v7, 0.0  ;;  %v353_v12 = vsel %vm351_vm1, %v2710_v8, 0.0  ;;  %v2723_v14 = vld [vmem:[%s2692_s24 + $0x20] sm:$0xff]  ;;  %v355_v16 = vsel %vm351_vm1, %v2713_v9, 0.0  ;;  %v2731_v18 = vld [vmem:[%s2692_s24 + $0x28] sm:$0xff] }
  0x3e   : > { %v354_v15 = vadd.f32 %v353_v12, %v352_v11  ;;  %v357_v17 = vsel %vm351_vm1, %v2716_v10, 0.0  ;;  %v359_v20 = vsel %vm351_vm1, %v2723_v14, 0.0  ;;  %2164 = vmatpush3.bf16.msra.mxu0 %v2163_v13  ;;  %v2736_v21 = vld [vmem:[%s2692_s24 + $0x30] sm:$0xff]  ;;  %v361_v23 = vsel %vm351_vm1, %v2731_v18, 0.0  ;;  %v2742_v24 = vld [vmem:[%s2692_s24 + $0x38] sm:$0xff]  ;;  %v2745_v26 = vld [vmem:[%s2692_s24 + $0x40] sm:$0xff] }
  0x3f   : > { %2213 = vmatprep.subr.bf16.mxu0 %v2550_v0  ;;  %v363_v27 = vsel %vm351_vm1, %v2736_v21, 0.0  ;;  %v365_v29 = vsel %vm351_vm1, %v2742_v24, 0.0  ;;  %v2752_v30 = vld [vmem:[%s2692_s24 + $0x48] sm:$0xff]  ;;  %v367_v32 = vsel %vm351_vm1, %v2745_v26, 0.0  ;;  %v423_v33 = vsel %vm351_vm1, %v2707_v7, -inf  ;;  %v2759_v34 = vld [vmem:[%s2692_s24 + $0x50] sm:$0xff] }
  0x40   : > { %v356_v19 = vadd.f32 %v355_v16, %v354_v15  ;;  %v424_v35 = vsel %vm351_vm1, %v2710_v8, -inf  ;;  %v425_v36 = vsel %vm351_vm1, %v2713_v9, -inf  ;;  %v426_v37 = vsel %vm351_vm1, %v2716_v10, -inf  ;;  %v2778_v44 = vld [vmem:[%s2692_s24 + $0x58] sm:$0xff]  ;;  %v2783_v48 = vld [vmem:[%s2692_s24 + $0x60] sm:$0xff]  ;;  %v2796_v58 = vld [vmem:[%s2692_s24 + $0x68] sm:$0xff] }
  0x41   : > { %v427_v38 = vsel %vm351_vm1, %v2723_v14, -inf  ;;  %v429_v40 = vsel %vm351_vm1, %v2731_v18, -inf  ;;  %v431_v41 = vsel %vm351_vm1, %v2736_v21, -inf  ;;  %v433_v42 = vsel %vm351_vm1, %v2742_v24, -inf  ;;  %v2801_v61 = vld [vmem:[%s2692_s24 + $0x70] sm:$0xff]  ;;  %v2804_v3 = vld [vmem:[%s2692_s24 + $0x78] sm:$0xff] }
  0x42   : > { %v358_v22 = vadd.f32 %v357_v17, %v356_v19  ;;  %v369_v43 = vsel %vm351_vm1, %v2752_v30, 0.0  ;;  %v371_v46 = vsel %vm351_vm1, %v2759_v34, 0.0  ;;  %v428_v47 = vmax.f32 %v423_v33, %v427_v38  ;;  %v2817_v15 = vld [vmem:[%s2692_s24 + $0x80] sm:$0xff]  ;;  %v2822_v19 = vld [vmem:[%s2692_s24 + $0x88] sm:$0xff]  ;;  %s2007_s18 = scalar_lea.sflag [#allocation5], %s312_s28  ;;  %s2479_s20 = scalar_lea.vmem %s3528_s14, 16 }
  0x43   : > { %v430_v49 = vmax.f32 %v424_v35, %v429_v40  ;;  %v432_v50 = vmax.f32 %v425_v36, %v431_v41  ;;  %v434_v51 = vmax.f32 %v426_v37, %v433_v42  ;;  %v435_v52 = vsel %vm351_vm1, %v2745_v26, -inf  ;;  %v2841_v38 = vld [vmem:[%s2692_s24 + $0xa0] sm:$0xff]  ;;  %p2480_p6 = scmp.ne.s32.totalorder %s3528_s14, %s2479_s20  ;;  %p3587_p9 = scmp.ne.s32.totalorder %s3580_s16, 0 }
  0x44   : > { %v360_v25 = vadd.f32 %v359_v20, %v358_v22  ;;  %v437_v54 = vsel %vm351_vm1, %v2752_v30, -inf  ;;  %v439_v55 = vsel %vm351_vm1, %v2759_v34, -inf  ;;  %v441_v56 = vsel %vm351_vm1, %v2778_v44, -inf  ;;  %v2825_v20 = vld [vmem:[%s2692_s24 + $0x90] sm:$0xff]  ;;  %s2554_s7 = smov [#allocation6]  }
  0x45   : > { %v373_v57 = vsel %vm351_vm1, %v2778_v44, 0.0  ;;  %v375_v60 = vsel %vm351_vm1, %v2783_v48, 0.0  ;;  %v436_v62 = vmax.f32 %v428_v47, %v435_v52  ;;  %v438_v63 = vmax.f32 %v430_v49, %v437_v54  ;;  %p2481_p10 = pnand %p2480_p6, %p3587_p9  ;;  %s2483_s23 = sshll.u32 %s2554_s7, 4  ;;  %s2484_s23 = int_to_ptr.vmem [resolvable:$false] %s2483_s23 }
  0x46   : > { %v362_v28 = vadd.f32 %v361_v23, %v360_v25  ;;  %v440_v1 = vmax.f32 %v432_v50, %v439_v55  ;;  %v442_v2 = vmax.f32 %v434_v51, %v441_v56  ;;  %v443_v5 = vsel %vm351_vm1, %v2783_v48, -inf  ;;  %v2865_v55 = vld [vmem:[%s2692_s24 + $0xc0] sm:$0xff]  ;;  %p2486_p2 = scmp.lt.s32.totalorder %s3528_s14, %s2484_s23 }
  0x47   : > { %v445_v6 = vsel %vm351_vm1, %v2796_v58, -inf  ;;  %v447_v11 = vsel %vm351_vm1, %v2801_v61, -inf  ;;  %v377_v12 = vsel %vm351_vm1, %v2796_v58, 0.0  ;;  %v449_v13 = vsel %vm351_vm1, %v2804_v3, -inf  ;;  %p2482_p12 = pneg %p2481_p10 }
  0x48   : > { %v364_v31 = vadd.f32 %v363_v27, %v362_v28  ;;  %v379_v17 = vsel %vm351_vm1, %v2801_v61, 0.0  ;;  %v444_v22 = vmax.f32 %v436_v62, %v443_v5  ;;  %v446_v23 = vmax.f32 %v438_v63, %v445_v6  ;;  %v2830_v28 = vld [vmem:[%s2692_s24 + $0x98] sm:$0xff] }
  0x49   : > { %v448_v25 = vmax.f32 %v440_v1, %v447_v11  ;;  %v451_v27 = vsel %vm351_vm1, %v2817_v15, -inf  ;;  %v455_v33 = vsel %vm351_vm1, %v2825_v20, -inf  ;;  %v381_v35 = vsel %vm351_vm1, %v2804_v3, 0.0  ;;  %v2875_v1 = vld [vmem:[%s2692_s24 + $0xd0] sm:$0xff] }
  0x4a   : > { %v366_v39 = vadd.f32 %v365_v29, %v364_v31  ;;  %v450_v31 = vmax.f32 %v442_v2, %v449_v13  ;;  %v457_v36 = vsel %vm351_vm1, %v2830_v28, -inf  ;;  %v383_v40 = vsel %vm351_vm1, %v2817_v15, 0.0  ;;  %v2878_v2 = vld [vmem:[%s2692_s24 + $0xd8] sm:$0xff] }
  0x4b   : > { %v452_v41 = vmax.f32 %v444_v22, %v451_v27  ;;  %v459_v50 = vsel %vm351_vm1, %v2841_v38, -inf  ;;  %v385_v52 = vsel %vm351_vm1, %v2822_v19, 0.0  ;;  %v467_v63 = vsel %vm351_vm1, %v2865_v55, -inf  ;;  %v2892_v22 = vld [vmem:[%s2692_s24 + $0xf8] sm:$0xff] }
  0x4c   : > { %v368_v45 = vadd.f32 %v367_v32, %v366_v39  ;;  %v453_v32 = vsel %vm351_vm1, %v2822_v19, -inf  ;;  %v2844_v39 = vld [vmem:[%s2692_s24 + $0xa8] sm:$0xff]  ;;  %v458_v49 = vmax.f32 %v450_v31, %v457_v36  ;;  %v471_v13 = vsel %vm351_vm1, %v2875_v1, -inf }
  0x4d   : > { %v454_v42 = vmax.f32 %v446_v23, %v453_v32  ;;  %v461_v51 = vsel %vm351_vm1, %v2844_v39, -inf  ;;  %v391_v27 = vsel %vm351_vm1, %v2841_v38, 0.0  ;;  %v2900_v32 = vld [vmem:[%s2692_s24 + $0xe8] sm:$0xff] }
  0x4e   : > { %v370_v53 = vadd.f32 %v369_v43, %v368_v45  ;;  %v456_v43 = vmax.f32 %v448_v25, %v455_v33  ;;  %v2849_v45 = vld [vmem:[%s2692_s24 + $0xb0] sm:$0xff]  ;;  %v2895_v25 = vld [vmem:[%s2692_s24 + $0xe0] sm:$0xff] }
  0x4f   : > { %v462_v62 = vmax.f32 %v454_v42, %v461_v51 }
  0x50   : > { %v372_v59 = vadd.f32 %v371_v46, %v370_v53  ;;  %v2852_v46 = vld [vmem:[%s2692_s24 + $0xb8] sm:$0xff]  ;;  %v463_v53 = vsel %vm351_vm1, %v2849_v45, -inf }
  0x51   : > { %v465_v54 = vsel %vm351_vm1, %v2852_v46, -inf  ;;  %v464_v5 = vmax.f32 %v456_v43, %v463_v53  ;;  %v481_v43 = vsel %vm351_vm1, %v2892_v22, -inf }
  0x52   : > { %v374_v4 = vadd.f32 %v373_v57, %v372_v59  ;;  %v2868_v57 = vld [vmem:[%s2692_s24 + $0xc8] sm:$0xff]  ;;  %v387_v59 = vsel %vm351_vm1, %v2825_v20, 0.0  ;;  %v466_v6 = vmax.f32 %v458_v49, %v465_v54  ;;  %v395_v49 = vsel %vm351_vm1, %v2849_v45, 0.0 }
  0x53   : > { %v469_v11 = vsel %vm351_vm1, %v2868_v57, -inf }
  0x54   : > { %v376_v16 = vadd.f32 %v375_v60, %v374_v4  ;;  %v460_v60 = vmax.f32 %v452_v41, %v459_v50  ;;  %v470_v31 = vmax.f32 %v462_v62, %v469_v11  ;;  %v477_v41 = vsel %vm351_vm1, %v2900_v32, -inf }
  0x55   : > { %v403_v11 = vsel %vm351_vm1, %v2875_v1, 0.0 }
  0x56   : > { %v378_v29 = vadd.f32 %v377_v12, %v376_v16  ;;  %v389_v12 = vsel %vm351_vm1, %v2830_v28, 0.0  ;;  %v473_v16 = vsel %vm351_vm1, %v2878_v2, -inf }
  0x57   : > { %v474_v36 = vmax.f32 %v466_v6, %v473_v16  ;;  %v405_v16 = vsel %vm351_vm1, %v2878_v2, 0.0 }
  0x58   : > { %v380_v37 = vadd.f32 %v379_v17, %v378_v29  ;;  %v2889_v17 = vld [vmem:[%s2692_s24 + $0xf0] sm:$0xff]  ;;  %v468_v29 = vmax.f32 %v460_v60, %v467_v63  ;;  %v399_v60 = vsel %vm351_vm1, %v2865_v55, 0.0  ;;  %s2485_s24 = scalar_lea.vmem %s2484_s23, 32 }
  0x59   : > { %v479_v42 = vsel %vm351_vm1, %v2889_v17, -inf  ;;  %v482_v54 = vmax.f32 %v474_v36, %v481_v43  ;;  %v411_v36 = vsel %vm351_vm1, %v2889_v17, 0.0  ;;  %p2487_p3 = scmp.lt.s32.totalorder %s2485_s24, %s2479_s20 }
  0x5a   : > { %v382_v47 = vadd.f32 %v381_v35, %v380_v37  ;;  %v472_v35 = vmax.f32 %v464_v5, %v471_v13  ;;  %v475_v37 = vsel %vm351_vm1, %v2895_v25, -inf  ;;  %v401_v5 = vsel %vm351_vm1, %v2868_v57, 0.0 }
  0x5b   : > { %v476_v50 = vmax.f32 %v468_v29, %v475_v37  ;;  %p2488_p4 = por %p2487_p3, %p2486_p2 }
  0x5c   : > { %v384_v56 = vadd.f32 %v383_v40, %v382_v47  ;;  %v393_v40 = vsel %vm351_vm1, %v2844_v39, 0.0  ;;  %v480_v53 = vmax.f32 %v472_v35, %v479_v42 }
  0x5d   : > { %p2489_p7 = pnand %p2488_p4, %p2482_p12 }
  0x5e   : > { %v386_v4 = vadd.f32 %v385_v52, %v384_v56  ;;  %v478_v52 = vmax.f32 %v470_v31, %v477_v41  ;;  %v397_v56 = vsel %vm351_vm1, %v2852_v46, 0.0  ;;  %v413_v41 = vsel %vm351_vm1, %v2892_v22, 0.0 }
  0x60   : > { %v388_v23 = vadd.f32 %v387_v59, %v386_v4  ;;  %v483_v63 = vmax.f32 %v476_v50, %v478_v52  ;;  %v484_v4 = vmax.f32 %v480_v53, %v482_v54  ;;  %v492_v52 = vlaneseq }
  0x62   : > { %v390_v33 = vadd.f32 %v389_v12, %v388_v23  ;;  %v485_v13 = vmax.f32 %v483_v63, %v484_v4 }
  0x64   : > { %v392_v47 = vadd.f32 %v391_v27, %v390_v33  ;;  %v407_v27 = vsel %vm351_vm1, %v2895_v25, 0.0  ;;  %v486_v31 = vrot.slane %v485_v13, 4  ;;  %v409_v33 = vsel %vm351_vm1, %v2900_v32, 0.0 }
  0x66   : > { %v394_v51 = vadd.f32 %v393_v40, %v392_v47  ;;  %v487_v40 = vmax.f32 %v485_v13, %v486_v31 }
  0x68   : > { %v396_v59 = vadd.f32 %v395_v49, %v394_v51  ;;  %v488_v47 = vrot.slane %v487_v40, 2 }
  0x6a   : > { %v398_v62 = vadd.f32 %v397_v56, %v396_v59  ;;  %v489_v51 = vmax.f32 %v487_v40, %v488_v47  ;;  %v493_v59 = vshrl.u32 %v492_v52, 7 }
  0x6c   : > { %v400_v6 = vadd.f32 %v399_v60, %v398_v62  ;;  %v490_v56 = vrot.slane %v489_v51, 1  ;;  %vm494_vm2 = vcmp.eq.s32.totalorder %v493_v59, 0 }
  0x6e   : > { %v402_v12 = vadd.f32 %v401_v5, %v400_v6  ;;  %v491_v63 = vmax.f32 %v489_v51, %v490_v56  ;;  %v581_v6 = vld [vmem:[%s3571_s3] sm:$0xf] }
  0x6f   : > { %2155 = vmatpush3.msk.msra.mxu1 %vm593_vm3, %v581_v6 }
  0x70   : > { %v404_v23 = vadd.f32 %v403_v11, %v402_v12  ;;  %2165 = vmatprep.subr.bf16.mxu1 %v2550_v0  ;;  %v2094_v11 = vld [vmem:[%s3570_s2] ss:$0 sm:$0xff] }
  0x72   : > { %v406_v29 = vadd.f32 %v405_v16, %v404_v23 }
  0x74   : > { %v408_v35 = vadd.f32 %v407_v27, %v406_v29  ;;  %v2096_v27 = vld [vmem:[%s3572_s4] ss:$0 sm:$0xff] }
  0x76   : > { %v410_v37 = vadd.f32 %v409_v33, %v408_v35 }
  0x78   : > { %v412_v42 = vadd.f32 %v411_v36, %v410_v37 }
  0x7a   : > { %v414_v43 = vadd.f32 %v413_v41, %v412_v42 }
  0x7c   : > { %v415_v49 = vrot.slane %v414_v43, 4 }
  0x7e   : > { %v416_v50 = vadd.f32 %v415_v49, %v414_v43 }
  0x80   : > { %v417_v53 = vrot.slane %v416_v50, 2 }
  0x82   : > { %v418_v54 = vadd.f32 %v417_v53, %v416_v50 }
  0x84   : > { %v419_v60 = vrot.slane %v418_v54, 1 }
  0x86   : > { %v420_v62 = vadd.f32 %v419_v60, %v418_v54 }
  0x88   : > { %v422_v4 = vmul.f32 0.00390625, %v420_v62 }
  0x8a   : > { %v495_v5 = vsel %vm494_vm2, %v422_v4, %v491_v63 }
  0x8b   : > { %2152 = vmatmul.mubr.msk.f32.vlgmr.msra.gmra.mrb[0].mxu0 %vm351_vm1, %v495_v5 }
 0x15e   : > { %v576_v12 = vpop.f32.mrb[0].mxu0 }
 0x15f   : > { %v577_v13 = vadd.f32 %v2094_v11, %v576_v12  ;;  %v2153_v16 = vpop.f32.mrb[1].mxu0 }
 0x161   : > { %v580_v23 = vmax.f32 %v577_v13, 0.0 }
 0x163   : > { %2157 = vmatmul.mubr.msk.f32.vlgmr.msra.gmra.mrb[0].mxu1 %vm589_vm4, %v580_v23 }
 0x236   : > { %v663_v29 = vpop.f32.mrb[0].mxu1 }
 0x237   : > { %v664_v31 = vadd.f32 %v2096_v27, %v663_v29  ;;  %v2158_v33 = vpop.f32.mrb[1].mxu1 }
 0x239   : > { %v668_v35 = vsel %vm667_vm5, %v664_v31, 0.0 }
 0x23a   : > { %v669_v36 = vrot.slane %v668_v35, 4 }
 0x23c   : > { %v670_v37 = vadd.f32 %v669_v36, %v668_v35 }
 0x23e   : > { %v671_v40 = vrot.slane %v670_v37, 2 }
 0x240   : > { %v672_v41 = vadd.f32 %v671_v40, %v670_v37 }
 0x242   : > { %v673_v42 = vrot.slane %v672_v41, 1 }
 0x244   : > { %v674_v43 = vadd.f32 %v673_v42, %v672_v41 }
 0x246   : > { %v2099_v47 = vmul.f32 -1.442695, %v674_v43 }
 0x248   : > { %2319 = vpow2.f32 %v2099_v47 }
 0x252   : > { %v2320_v49 = vpop.eup %2319 }
 0x253   : > { %v678_v50 = vadd.f32 1.0, %v2320_v49 }
 0x255   : > { %2321 = vrcp.f32 %v678_v50 }
 0x25f   : > { %v2943_v51 = vpop.eup %2321 }
 0x260   : > { %v2947_v52 = vmul.f32 %v2943_v51, %v2707_v7  ;;  %v2955_v56 = vmul.f32 %v2943_v51, %v2710_v8  ;;  %v2963_v7 = vmul.f32 %v2943_v51, %v2716_v10  ;;  %v2967_v62 = vmul.f32 %v2943_v51, %v2713_v9 }
 0x261   : > { %v2979_v9 = vmul.f32 %v2943_v51, %v2731_v18  ;;  %v2983_v5 = vmul.f32 %v2943_v51, %v2723_v14  ;;  %v2995_v14 = vmul.f32 %v2943_v51, %v2742_v24  ;;  %v2999_v13 = vmul.f32 %v2943_v51, %v2736_v21 }
 0x262   : > { %v842_v53 = vsel %vm351_vm1, %v2947_v52, -inf  ;;  %v713_v54 = vsel %vm351_vm1, %v2947_v52, 0.0  ;;  %v845_v59 = vsel %vm351_vm1, %v2955_v56, -inf  ;;  %v716_v60 = vsel %vm351_vm1, %v2955_v56, 0.0 }
 0x263   : > { %843 = vmax.xlane.f32.xlu1 %v842_v53  ;;  %714 = vadd.xlane.f32.xlu0 %v713_v54  ;;  %v722_v8 = vsel %vm351_vm1, %v2963_v7, 0.0  ;;  %v719_v63 = vsel %vm351_vm1, %v2967_v62, 0.0  ;;  %v851_v4 = vsel %vm351_vm1, %v2963_v7, -inf  ;;  %v848_v10 = vsel %vm351_vm1, %v2967_v62, -inf }
 0x264   : > { %v728_v6 = vsel %vm351_vm1, %v2979_v9, 0.0  ;;  %v725_v11 = vsel %vm351_vm1, %v2983_v5, 0.0  ;;  %v857_v12 = vsel %vm351_vm1, %v2979_v9, -inf  ;;  %v854_v18 = vsel %vm351_vm1, %v2983_v5, -inf }
 0x265   : > { %v734_v16 = vsel %vm351_vm1, %v2995_v14, 0.0  ;;  %v731_v23 = vsel %vm351_vm1, %v2999_v13, 0.0  ;;  %v863_v27 = vsel %vm351_vm1, %v2995_v14, -inf  ;;  %v860_v24 = vsel %vm351_vm1, %v2999_v13, -inf }
 0x266   : > { %v3011_v21 = vmul.f32 %v2943_v51, %v2752_v30  ;;  %v3015_v29 = vmul.f32 %v2943_v51, %v2745_v26  ;;  %v3027_v26 = vmul.f32 %v2943_v51, %v2778_v44  ;;  %v3031_v36 = vmul.f32 %v2943_v51, %v2759_v34 }
 0x267   : > { %846 = vmax.xlane.f32.xlu1 %v845_v59  ;;  %717 = vadd.xlane.f32.xlu0 %v716_v60  ;;  %v3043_v34 = vmul.f32 %v2943_v51, %v2796_v58  ;;  %v3047_v42 = vmul.f32 %v2943_v51, %v2783_v48  ;;  %v3059_v48 = vmul.f32 %v2943_v51, %v2804_v3 }
 0x268   : > { %v740_v31 = vsel %vm351_vm1, %v3011_v21, 0.0  ;;  %v737_v33 = vsel %vm351_vm1, %v3015_v29, 0.0  ;;  %v869_v35 = vsel %vm351_vm1, %v3011_v21, -inf  ;;  %v866_v30 = vsel %vm351_vm1, %v3015_v29, -inf }
 0x269   : > { %v746_v37 = vsel %vm351_vm1, %v3027_v26, 0.0  ;;  %v743_v40 = vsel %vm351_vm1, %v3031_v36, 0.0  ;;  %v875_v41 = vsel %vm351_vm1, %v3027_v26, -inf  ;;  %v872_v44 = vsel %vm351_vm1, %v3031_v36, -inf }
 0x26a   : > { %v752_v43 = vsel %vm351_vm1, %v3043_v34, 0.0  ;;  %v749_v47 = vsel %vm351_vm1, %v3047_v42, 0.0  ;;  %v881_v49 = vsel %vm351_vm1, %v3043_v34, -inf  ;;  %v878_v58 = vsel %vm351_vm1, %v3047_v42, -inf }
 0x26b   : > { %723 = vadd.xlane.f32.xlu1 %v722_v8  ;;  %720 = vadd.xlane.f32.xlu0 %v719_v63  ;;  %v3063_v50 = vmul.f32 %v2943_v51, %v2801_v61  ;;  %v758_v53 = vsel %vm351_vm1, %v3059_v48, 0.0  ;;  %v887_v59 = vsel %vm351_vm1, %v3059_v48, -inf  ;;  %v3075_v61 = vmul.f32 %v2943_v51, %v2822_v19 }
 0x26c   : > { %v3079_v60 = vmul.f32 %v2943_v51, %v2817_v15  ;;  %v3091_v15 = vmul.f32 %v2943_v51, %v2830_v28 }
 0x26d   : > { %v755_v54 = vsel %vm351_vm1, %v3063_v50, 0.0  ;;  %v884_v3 = vsel %vm351_vm1, %v3063_v50, -inf  ;;  %v764_v8 = vsel %vm351_vm1, %v3075_v61, 0.0 }
 0x26e   : > { %v761_v63 = vsel %vm351_vm1, %v3079_v60, 0.0  ;;  %v890_v19 = vsel %vm351_vm1, %v3079_v60, -inf }
 0x26f   : > { %852 = vmax.xlane.f32.xlu1 %v851_v4  ;;  %849 = vmax.xlane.f32.xlu0 %v848_v10  ;;  %v893_v4 = vsel %vm351_vm1, %v3075_v61, -inf  ;;  %v3095_v10 = vmul.f32 %v2943_v51, %v2825_v20  ;;  %v3107_v20 = vmul.f32 %v2943_v51, %v2844_v39 }
 0x271   : > { %v896_v28 = vsel %vm351_vm1, %v3095_v10, -inf }
 0x273   : > { %729 = vadd.xlane.f32.xlu1 %v728_v6  ;;  %726 = vadd.xlane.f32.xlu0 %v725_v11  ;;  %v770_v6 = vsel %vm351_vm1, %v3091_v15, 0.0  ;;  %v767_v11 = vsel %vm351_vm1, %v3095_v10, 0.0 }
 0x277   : > { %858 = vmax.xlane.f32.xlu1 %v857_v12  ;;  %855 = vmax.xlane.f32.xlu0 %v854_v18  ;;  %v899_v12 = vsel %vm351_vm1, %v3091_v15, -inf  ;;  %v3111_v18 = vmul.f32 %v2943_v51, %v2841_v38  ;;  %v3123_v38 = vmul.f32 %v2943_v51, %v2852_v46 }
 0x279   : > { %v902_v39 = vsel %vm351_vm1, %v3111_v18, -inf }
 0x27b   : > { %735 = vadd.xlane.f32.xlu1 %v734_v16  ;;  %732 = vadd.xlane.f32.xlu0 %v731_v23  ;;  %v776_v16 = vsel %vm351_vm1, %v3107_v20, 0.0  ;;  %v773_v23 = vsel %vm351_vm1, %v3111_v18, 0.0 }
 0x27f   : > { %864 = vmax.xlane.f32.xlu1 %v863_v27  ;;  %861 = vmax.xlane.f32.xlu0 %v860_v24  ;;  %v905_v27 = vsel %vm351_vm1, %v3107_v20, -inf  ;;  %v3127_v24 = vmul.f32 %v2943_v51, %v2849_v45  ;;  %v3139_v45 = vmul.f32 %v2943_v51, %v2868_v57 }
 0x281   : > { %v908_v46 = vsel %vm351_vm1, %v3127_v24, -inf }
 0x283   : > { %741 = vadd.xlane.f32.xlu1 %v740_v31  ;;  %738 = vadd.xlane.f32.xlu0 %v737_v33  ;;  %v782_v31 = vsel %vm351_vm1, %v3123_v38, 0.0  ;;  %v779_v33 = vsel %vm351_vm1, %v3127_v24, 0.0 }
 0x287   : > { %870 = vmax.xlane.f32.xlu1 %v869_v35  ;;  %867 = vmax.xlane.f32.xlu0 %v866_v30  ;;  %v911_v35 = vsel %vm351_vm1, %v3123_v38, -inf  ;;  %v3143_v30 = vmul.f32 %v2943_v51, %v2865_v55  ;;  %v3155_v55 = vmul.f32 %v2943_v51, %v2878_v2 }
 0x289   : > { %v914_v57 = vsel %vm351_vm1, %v3143_v30, -inf }
 0x28b   : > { %747 = vadd.xlane.f32.xlu1 %v746_v37  ;;  %744 = vadd.xlane.f32.xlu0 %v743_v40  ;;  %v788_v37 = vsel %vm351_vm1, %v3139_v45, 0.0  ;;  %v785_v40 = vsel %vm351_vm1, %v3143_v30, 0.0 }
 0x28f   : > { %876 = vmax.xlane.f32.xlu1 %v875_v41  ;;  %873 = vmax.xlane.f32.xlu0 %v872_v44  ;;  %v917_v41 = vsel %vm351_vm1, %v3139_v45, -inf  ;;  %v3159_v44 = vmul.f32 %v2943_v51, %v2875_v1  ;;  %v3171_v1 = vmul.f32 %v2943_v51, %v2900_v32 }
 0x291   : > { %v920_v2 = vsel %vm351_vm1, %v3159_v44, -inf }
 0x293   : > { %753 = vadd.xlane.f32.xlu1 %v752_v43  ;;  %750 = vadd.xlane.f32.xlu0 %v749_v47  ;;  %v794_v43 = vsel %vm351_vm1, %v3155_v55, 0.0  ;;  %v791_v47 = vsel %vm351_vm1, %v3159_v44, 0.0 }
 0x297   : > { %882 = vmax.xlane.f32.xlu1 %v881_v49  ;;  %879 = vmax.xlane.f32.xlu0 %v878_v58  ;;  %v923_v49 = vsel %vm351_vm1, %v3155_v55, -inf  ;;  %v3175_v58 = vmul.f32 %v2943_v51, %v2895_v25  ;;  %v3187_v25 = vmul.f32 %v2943_v51, %v2892_v22 }
 0x299   : > { %v926_v32 = vsel %vm351_vm1, %v3175_v58, -inf }
 0x29b   : > { %759 = vadd.xlane.f32.xlu1 %v758_v53  ;;  %756 = vadd.xlane.f32.xlu0 %v755_v54  ;;  %v800_v53 = vsel %vm351_vm1, %v3171_v1, 0.0  ;;  %v797_v54 = vsel %vm351_vm1, %v3175_v58, 0.0 }
 0x29f   : > { %888 = vmax.xlane.f32.xlu1 %v887_v59  ;;  %885 = vmax.xlane.f32.xlu0 %v884_v3  ;;  %v929_v59 = vsel %vm351_vm1, %v3171_v1, -inf  ;;  %v3191_v3 = vmul.f32 %v2943_v51, %v2889_v17  ;;  %v939_v17 = vld [vmem:[%s3573_s5 + $0x8] sm:$0xff] }
 0x2a0   : > { %v1003_v51 = vld [vmem:[#allocation3 + $0x8] sm:$0xff]  ;;  %1355 = vmatprep.mubr.f32.mxu0 %v939_v17 }
 0x2a1   : > { %v932_v22 = vsel %vm351_vm1, %v3191_v3, -inf  ;;  %1130 = vmatprep.mubr.f32.mxu1 %v1003_v51 }
 0x2a3   : > { %765 = vadd.xlane.f32.xlu1 %v764_v8  ;;  %762 = vadd.xlane.f32.xlu0 %v761_v63  ;;  %v806_v8 = vsel %vm351_vm1, %v3187_v25, 0.0  ;;  %v803_v63 = vsel %vm351_vm1, %v3191_v3, 0.0 }
 0x2a7   : > { %894 = vmax.xlane.f32.xlu1 %v893_v4  ;;  %891 = vmax.xlane.f32.xlu0 %v890_v19  ;;  %v935_v4 = vsel %vm351_vm1, %v3187_v25, -inf }
 0x2ab   : > { %771 = vadd.xlane.f32.xlu1 %v770_v6  ;;  %768 = vadd.xlane.f32.xlu0 %v767_v11 }
 0x2af   : > { %900 = vmax.xlane.f32.xlu1 %v899_v12  ;;  %897 = vmax.xlane.f32.xlu0 %v896_v28 }
 0x2b3   : > { %777 = vadd.xlane.f32.xlu1 %v776_v16  ;;  %774 = vadd.xlane.f32.xlu0 %v773_v23 }
 0x2b7   : > { %906 = vmax.xlane.f32.xlu1 %v905_v27  ;;  %903 = vmax.xlane.f32.xlu0 %v902_v39 }
 0x2bb   : > { %783 = vadd.xlane.f32.xlu1 %v782_v31  ;;  %780 = vadd.xlane.f32.xlu0 %v779_v33 }
 0x2bf   : > { %912 = vmax.xlane.f32.xlu1 %v911_v35  ;;  %909 = vmax.xlane.f32.xlu0 %v908_v46 }
 0x2c3   : > { %789 = vadd.xlane.f32.xlu1 %v788_v37  ;;  %786 = vadd.xlane.f32.xlu0 %v785_v40 }
 0x2c7   : > { %918 = vmax.xlane.f32.xlu1 %v917_v41  ;;  %915 = vmax.xlane.f32.xlu0 %v914_v57 }
 0x2cb   : > { %795 = vadd.xlane.f32.xlu1 %v794_v43  ;;  %792 = vadd.xlane.f32.xlu0 %v791_v47 }
 0x2cf   : > { %924 = vmax.xlane.f32.xlu1 %v923_v49  ;;  %921 = vmax.xlane.f32.xlu0 %v920_v2 }
 0x2d3   : > { %801 = vadd.xlane.f32.xlu1 %v800_v53  ;;  %798 = vadd.xlane.f32.xlu0 %v797_v54 }
 0x2d7   : > { %930 = vmax.xlane.f32.xlu1 %v929_v59  ;;  %927 = vmax.xlane.f32.xlu0 %v926_v32 }
 0x2db   : > { %807 = vadd.xlane.f32.xlu1 %v806_v8  ;;  %804 = vadd.xlane.f32.xlu0 %v803_v63 }
 0x2df   : > { %936 = vmax.xlane.f32.xlu1 %v935_v4  ;;  %933 = vmax.xlane.f32.xlu0 %v932_v22 }
 0x2f0   : > { %v844_v19 = vpop.xlane.xlu1 %843  ;;  %v715_v6 = vpop.xlane.xlu0 %714 }
 0x2f1   : > { %v810_v28 = vmul.f32 0.03125, %v715_v6 }
 0x2f4   : > { %v847_v11 = vpop.xlane.xlu1 %846  ;;  %v718_v12 = vpop.xlane.xlu0 %717 }
 0x2f5   : > { %v2166_v16 = vpack.c.bf16 %v847_v11, %v844_v19  ;;  %v811_v23 = vmul.f32 0.03125, %v718_v12 }
 0x2f7   : > { %v2214_v27 = vpack.c.bf16 %v811_v23, %v810_v28  ;;  %2167 = vmatpush1.bf16.msra.mxu1 %v2166_v16 }
 0x2f8   : > { %v724_v39 = vpop.xlane.xlu1 %723  ;;  %v721_v31 = vpop.xlane.xlu0 %720  ;;  %2168 = vmatprep.subr.bf16.mxu1 %v2550_v0 }
 0x2f9   : > { %v813_v33 = vmul.f32 0.03125, %v724_v39  ;;  %v812_v35 = vmul.f32 0.03125, %v721_v31  ;;  %2215 = vmatpush1.bf16.msra.mxu0 %v2214_v27 }
 0x2fa   : > { %2216 = vmatprep.subr.bf16.mxu0 %v2550_v0 }
 0x2fb   : > { %v2217_v46 = vpack.c.bf16 %v813_v33, %v812_v35 }
 0x2fc   : > { %v853_v37 = vpop.xlane.xlu1 %852  ;;  %v850_v40 = vpop.xlane.xlu0 %849 }
 0x2fd   : > { %v2169_v41 = vpack.c.bf16 %v853_v37, %v850_v40  ;;  %2218 = vmatpush1.bf16.msra.mxu0 %v2217_v46 }
 0x2fe   : > { %2219 = vmatprep.subr.bf16.mxu0 %v2550_v0 }
 0x2ff   : > { %2170 = vmatpush1.bf16.msra.mxu1 %v2169_v41 }
 0x300   : > { %v730_v57 = vpop.xlane.xlu1 %729  ;;  %v727_v43 = vpop.xlane.xlu0 %726  ;;  %2171 = vmatprep.subr.bf16.mxu1 %v2550_v0 }
 0x301   : > { %v815_v47 = vmul.f32 0.03125, %v730_v57  ;;  %v814_v49 = vmul.f32 0.03125, %v727_v43 }
 0x303   : > { %v2220_v2 = vpack.c.bf16 %v815_v47, %v814_v49 }
 0x304   : > { %v859_v53 = vpop.xlane.xlu1 %858  ;;  %v856_v54 = vpop.xlane.xlu0 %855 }
 0x305   : > { %v2172_v59 = vpack.c.bf16 %v859_v53, %v856_v54  ;;  %2221 = vmatpush1.bf16.msra.mxu0 %v2220_v2 }
 0x306   : > { %2222 = vmatprep.subr.bf16.mxu0 %v2550_v0 }
 0x307   : > { %2173 = vmatpush1.bf16.msra.mxu1 %v2172_v59 }
 0x308   : > { %v736_v32 = vpop.xlane.xlu1 %735  ;;  %v733_v8 = vpop.xlane.xlu0 %732  ;;  %2174 = vmatprep.subr.bf16.mxu1 %v2550_v0 }
 0x309   : > { %v817_v63 = vmul.f32 0.03125, %v736_v32  ;;  %v816_v4 = vmul.f32 0.03125, %v733_v8 }
 0x30b   : > { %v2223_v22 = vpack.c.bf16 %v817_v63, %v816_v4 }
 0x30c   : > { %v865_v17 = vpop.xlane.xlu1 %864  ;;  %v862_v51 = vpop.xlane.xlu0 %861 }
 0x30d   : > { %v2175_v19 = vpack.c.bf16 %v865_v17, %v862_v51  ;;  %2224 = vmatpush1.bf16.msra.mxu0 %v2223_v22 }
 0x30e   : > { %2225 = vmatprep.subr.bf16.mxu0 %v2550_v0 }
 0x30f   : > { %2176 = vmatpush1.bf16.msra.mxu1 %v2175_v19 }
 0x310   : > { %v742_v6 = vpop.xlane.xlu1 %741  ;;  %v739_v11 = vpop.xlane.xlu0 %738  ;;  %2177 = vmatprep.subr.bf16.mxu1 %v2550_v0 }
 0x311   : > { %v819_v12 = vmul.f32 0.03125, %v742_v6  ;;  %v818_v28 = vmul.f32 0.03125, %v739_v11 }
 0x313   : > { %v2226_v16 = vpack.c.bf16 %v819_v12, %v818_v28 }
 0x314   : > { %v871_v23 = vpop.xlane.xlu1 %870  ;;  %v868_v27 = vpop.xlane.xlu0 %867 }
 0x315   : > { %v2178_v39 = vpack.c.bf16 %v871_v23, %v868_v27  ;;  %2227 = vmatpush1.bf16.msra.mxu0 %v2226_v16 }
 0x316   : > { %2228 = vmatprep.subr.bf16.mxu0 %v2550_v0 }
 0x317   : > { %2179 = vmatpush1.bf16.msra.mxu1 %v2178_v39 }
 0x318   : > { %v748_v31 = vpop.xlane.xlu1 %747  ;;  %v745_v33 = vpop.xlane.xlu0 %744  ;;  %2180 = vmatprep.subr.bf16.mxu1 %v2550_v0 }
 0x319   : > { %v821_v35 = vmul.f32 0.03125, %v748_v31  ;;  %v820_v46 = vmul.f32 0.03125, %v745_v33 }
 0x31b   : > { %v2229_v37 = vpack.c.bf16 %v821_v35, %v820_v46 }
 0x31c   : > { %v877_v40 = vpop.xlane.xlu1 %876  ;;  %v874_v41 = vpop.xlane.xlu0 %873 }
 0x31d   : > { %v2181_v57 = vpack.c.bf16 %v877_v40, %v874_v41  ;;  %2230 = vmatpush1.bf16.msra.mxu0 %v2229_v37 }
 0x31e   : > { %2231 = vmatprep.subr.bf16.mxu0 %v2550_v0 }
 0x31f   : > { %2182 = vmatpush1.bf16.msra.mxu1 %v2181_v57 }
 0x320   : > { %v754_v43 = vpop.xlane.xlu1 %753  ;;  %v751_v47 = vpop.xlane.xlu0 %750  ;;  %2183 = vmatprep.subr.bf16.mxu1 %v2550_v0 }
 0x321   : > { %v823_v49 = vmul.f32 0.03125, %v754_v43  ;;  %v822_v2 = vmul.f32 0.03125, %v751_v47 }
 0x323   : > { %v2232_v53 = vpack.c.bf16 %v823_v49, %v822_v2 }
 0x324   : > { %v883_v54 = vpop.xlane.xlu1 %882  ;;  %v880_v59 = vpop.xlane.xlu0 %879 }
 0x325   : > { %v2184_v32 = vpack.c.bf16 %v883_v54, %v880_v59  ;;  %2233 = vmatpush1.bf16.msra.mxu0 %v2232_v53 }
 0x326   : > { %2234 = vmatprep.subr.bf16.mxu0 %v2550_v0 }
 0x327   : > { %2185 = vmatpush1.bf16.msra.mxu1 %v2184_v32 }
 0x328   : > { %v760_v8 = vpop.xlane.xlu1 %759  ;;  %v757_v63 = vpop.xlane.xlu0 %756  ;;  %2186 = vmatprep.subr.bf16.mxu1 %v2550_v0 }
 0x329   : > { %v825_v4 = vmul.f32 0.03125, %v760_v8  ;;  %v824_v22 = vmul.f32 0.03125, %v757_v63 }
 0x32b   : > { %v2235_v17 = vpack.c.bf16 %v825_v4, %v824_v22 }
 0x32c   : > { %v889_v51 = vpop.xlane.xlu1 %888  ;;  %v886_v19 = vpop.xlane.xlu0 %885 }
 0x32d   : > { %v2187_v6 = vpack.c.bf16 %v889_v51, %v886_v19  ;;  %2236 = vmatpush1.bf16.msra.mxu0 %v2235_v17 }
 0x32e   : > { %2237 = vmatprep.subr.bf16.mxu0 %v2550_v0 }
 0x32f   : > { %2188 = vmatpush1.bf16.msra.mxu1 %v2187_v6 }
 0x330   : > { %v766_v11 = vpop.xlane.xlu1 %765  ;;  %v763_v12 = vpop.xlane.xlu0 %762  ;;  %2189 = vmatprep.subr.bf16.mxu1 %v2550_v0 }
 0x331   : > { %v827_v28 = vmul.f32 0.03125, %v766_v11  ;;  %v826_v16 = vmul.f32 0.03125, %v763_v12 }
 0x333   : > { %v2238_v23 = vpack.c.bf16 %v827_v28, %v826_v16 }
 0x334   : > { %v895_v27 = vpop.xlane.xlu1 %894  ;;  %v892_v39 = vpop.xlane.xlu0 %891 }
 0x335   : > { %v2190_v31 = vpack.c.bf16 %v895_v27, %v892_v39  ;;  %2239 = vmatpush1.bf16.msra.mxu0 %v2238_v23 }
 0x336   : > { %2240 = vmatprep.subr.bf16.mxu0 %v2550_v0 }
 0x337   : > { %2191 = vmatpush1.bf16.msra.mxu1 %v2190_v31 }
 0x338   : > { %v772_v33 = vpop.xlane.xlu1 %771  ;;  %v769_v35 = vpop.xlane.xlu0 %768  ;;  %2192 = vmatprep.subr.bf16.mxu1 %v2550_v0 }
 0x339   : > { %v829_v46 = vmul.f32 0.03125, %v772_v33  ;;  %v828_v37 = vmul.f32 0.03125, %v769_v35 }
 0x33b   : > { %v2241_v40 = vpack.c.bf16 %v829_v46, %v828_v37 }
 0x33c   : > { %v901_v41 = vpop.xlane.xlu1 %900  ;;  %v898_v57 = vpop.xlane.xlu0 %897 }
 0x33d   : > { %v2193_v43 = vpack.c.bf16 %v901_v41, %v898_v57  ;;  %2242 = vmatpush1.bf16.msra.mxu0 %v2241_v40 }
 0x33e   : > { %2243 = vmatprep.subr.bf16.mxu0 %v2550_v0 }
 0x33f   : > { %2194 = vmatpush1.bf16.msra.mxu1 %v2193_v43 }
 0x340   : > { %v778_v47 = vpop.xlane.xlu1 %777  ;;  %v775_v49 = vpop.xlane.xlu0 %774  ;;  %2195 = vmatprep.subr.bf16.mxu1 %v2550_v0 }
 0x341   : > { %v831_v2 = vmul.f32 0.03125, %v778_v47  ;;  %v830_v53 = vmul.f32 0.03125, %v775_v49 }
 0x343   : > { %v2244_v54 = vpack.c.bf16 %v831_v2, %v830_v53 }
 0x344   : > { %v907_v59 = vpop.xlane.xlu1 %906  ;;  %v904_v32 = vpop.xlane.xlu0 %903 }
 0x345   : > { %v2196_v8 = vpack.c.bf16 %v907_v59, %v904_v32  ;;  %2245 = vmatpush1.bf16.msra.mxu0 %v2244_v54 }
 0x346   : > { %2246 = vmatprep.subr.bf16.mxu0 %v2550_v0 }
 0x347   : > { %2197 = vmatpush1.bf16.msra.mxu1 %v2196_v8 }
 0x348   : > { %v784_v63 = vpop.xlane.xlu1 %783  ;;  %v781_v4 = vpop.xlane.xlu0 %780  ;;  %2198 = vmatprep.subr.bf16.mxu1 %v2550_v0 }
 0x349   : > { %v833_v22 = vmul.f32 0.03125, %v784_v63  ;;  %v832_v17 = vmul.f32 0.03125, %v781_v4 }
 0x34b   : > { %v2247_v51 = vpack.c.bf16 %v833_v22, %v832_v17 }
 0x34c   : > { %v913_v19 = vpop.xlane.xlu1 %912  ;;  %v910_v6 = vpop.xlane.xlu0 %909 }
 0x34d   : > { %v2199_v11 = vpack.c.bf16 %v913_v19, %v910_v6  ;;  %2248 = vmatpush1.bf16.msra.mxu0 %v2247_v51 }
 0x34e   : > { %2249 = vmatprep.subr.bf16.mxu0 %v2550_v0 }
 0x34f   : > { %2200 = vmatpush1.bf16.msra.mxu1 %v2199_v11 }
 0x350   : > { %v790_v12 = vpop.xlane.xlu1 %789  ;;  %v787_v28 = vpop.xlane.xlu0 %786  ;;  %2201 = vmatprep.subr.bf16.mxu1 %v2550_v0 }
 0x351   : > { %v835_v16 = vmul.f32 0.03125, %v790_v12  ;;  %v834_v23 = vmul.f32 0.03125, %v787_v28  ;;  %v938_v28 = vld [vmem:[%s3573_s5] sm:$0xff] }
 0x353   : > { %v2250_v27 = vpack.c.bf16 %v835_v16, %v834_v23  ;;  %v941_v16 = vld [vmem:[%s3573_s5 + $0x18] sm:$0xff]  ;;  %v1002_v23 = vld [vmem:[#allocation3] sm:$0xff] }
 0x354   : > { %v919_v39 = vpop.xlane.xlu1 %918  ;;  %v916_v31 = vpop.xlane.xlu0 %915 }
 0x355   : > { %v2202_v33 = vpack.c.bf16 %v919_v39, %v916_v31  ;;  %2251 = vmatpush1.bf16.msra.mxu0 %v2250_v27  ;;  %v1005_v27 = vld [vmem:[#allocation3 + $0x18] sm:$0xff]  ;;  %v943_v39 = vld [vmem:[%s3573_s5 + $0x28] sm:$0xff]  ;;  %v1004_v31 = vld [vmem:[#allocation3 + $0x10] sm:$0xff] }
 0x356   : > { %2252 = vmatprep.subr.bf16.mxu0 %v2550_v0 }
 0x357   : > { %2203 = vmatpush1.bf16.msra.mxu1 %v2202_v33  ;;  %v1007_v33 = vld [vmem:[#allocation3 + $0x28] sm:$0xff] }
 0x358   : > { %v796_v35 = vpop.xlane.xlu1 %795  ;;  %v793_v46 = vpop.xlane.xlu0 %792  ;;  %2204 = vmatprep.subr.bf16.mxu1 %v2550_v0 }
 0x359   : > { %v837_v37 = vmul.f32 0.03125, %v796_v35  ;;  %v836_v40 = vmul.f32 0.03125, %v793_v46  ;;  %v942_v35 = vld [vmem:[%s3573_s5 + $0x20] sm:$0xff]  ;;  %v945_v46 = vld [vmem:[%s3573_s5 + $0x38] sm:$0xff] }
 0x35b   : > { %v2253_v41 = vpack.c.bf16 %v837_v37, %v836_v40  ;;  %v1006_v37 = vld [vmem:[#allocation3 + $0x20] sm:$0xff]  ;;  %v1009_v40 = vld [vmem:[#allocation3 + $0x38] sm:$0xff] }
 0x35c   : > { %v925_v57 = vpop.xlane.xlu1 %924  ;;  %v922_v43 = vpop.xlane.xlu0 %921 }
 0x35d   : > { %v2205_v47 = vpack.c.bf16 %v925_v57, %v922_v43  ;;  %2254 = vmatpush1.bf16.msra.mxu0 %v2253_v41  ;;  %v944_v41 = vld [vmem:[%s3573_s5 + $0x30] sm:$0xff]  ;;  %v947_v57 = vld [vmem:[%s3573_s5 + $0x48] sm:$0xff] }
 0x35e   : > { %2255 = vmatprep.subr.bf16.mxu0 %v2550_v0  ;;  %v1008_v43 = vld [vmem:[#allocation3 + $0x30] sm:$0xff] }
 0x35f   : > { %2206 = vmatpush1.bf16.msra.mxu1 %v2205_v47  ;;  %v1011_v47 = vld [vmem:[#allocation3 + $0x48] sm:$0xff] }
 0x360   : > { %v802_v49 = vpop.xlane.xlu1 %801  ;;  %v799_v2 = vpop.xlane.xlu0 %798  ;;  %2207 = vmatprep.subr.bf16.mxu1 %v2550_v0 }
 0x361   : > { %v839_v53 = vmul.f32 0.03125, %v802_v49  ;;  %v838_v54 = vmul.f32 0.03125, %v799_v2  ;;  %v946_v49 = vld [vmem:[%s3573_s5 + $0x40] sm:$0xff]  ;;  %v949_v2 = vld [vmem:[%s3573_s5 + $0x58] sm:$0xff] }
 0x363   : > { %v2256_v59 = vpack.c.bf16 %v839_v53, %v838_v54  ;;  %v1010_v53 = vld [vmem:[#allocation3 + $0x40] sm:$0xff]  ;;  %v1013_v54 = vld [vmem:[#allocation3 + $0x58] sm:$0xff] }
 0x364   : > { %v931_v32 = vpop.xlane.xlu1 %930  ;;  %v928_v8 = vpop.xlane.xlu0 %927 }
 0x365   : > { %v2208_v63 = vpack.c.bf16 %v931_v32, %v928_v8  ;;  %2257 = vmatpush1.bf16.msra.mxu0 %v2256_v59  ;;  %v948_v59 = vld [vmem:[%s3573_s5 + $0x50] sm:$0xff]  ;;  %v951_v32 = vld [vmem:[%s3573_s5 + $0x68] sm:$0xff] }
 0x366   : > { %2258 = vmatprep.subr.bf16.mxu0 %v2550_v0  ;;  %v1012_v8 = vld [vmem:[#allocation3 + $0x50] sm:$0xff] }
 0x367   : > { %2209 = vmatpush1.bf16.msra.mxu1 %v2208_v63  ;;  %v1015_v63 = vld [vmem:[#allocation3 + $0x68] sm:$0xff] }
 0x368   : > { %v808_v4 = vpop.xlane.xlu1 %807  ;;  %v805_v22 = vpop.xlane.xlu0 %804  ;;  %2210 = vmatprep.subr.bf16.mxu1 %v2550_v0  ;;  %v940_v0 = vld [vmem:[%s3573_s5 + $0x10] sm:$0xff] }
 0x369   : > { %v841_v17 = vmul.f32 0.03125, %v808_v4  ;;  %v840_v51 = vmul.f32 0.03125, %v805_v22  ;;  %v950_v4 = vld [vmem:[%s3573_s5 + $0x60] sm:$0xff]  ;;  %v953_v22 = vld [vmem:[%s3573_s5 + $0x78] sm:$0xff] }
 0x36b   : > { %v2259_v19 = vpack.c.bf16 %v841_v17, %v840_v51  ;;  %v1014_v17 = vld [vmem:[#allocation3 + $0x60] sm:$0xff]  ;;  %v1017_v51 = vld [vmem:[#allocation3 + $0x78] sm:$0xff] }
 0x36c   : > { %v937_v6 = vpop.xlane.xlu1 %936  ;;  %v934_v11 = vpop.xlane.xlu0 %933 }
 0x36d   : > { %v2211_v12 = vpack.c.bf16 %v937_v6, %v934_v11  ;;  %2260 = vmatpush1.bf16.msra.mxu0 %v2259_v19  ;;  %v952_v19 = vld [vmem:[%s3573_s5 + $0x70] sm:$0xff]  ;;  %v955_v6 = vld [vmem:[%s3573_s5 + $0x88] sm:$0xff] }
 0x36e   : > { %v1016_v11 = vld [vmem:[#allocation3 + $0x70] sm:$0xff] }
 0x36f   : > { %2212 = vmatpush1.bf16.msra.mxu1 %v2211_v12  ;;  %v1019_v12 = vld [vmem:[#allocation3 + $0x88] sm:$0xff] }
 0x370   : > { %1356 = vmatmul.mubr.f32.vlgmr.msra.gmra.mrb[2].mxu0 %v938_v28  ;;  %v954_v28 = vld [vmem:[%s3573_s5 + $0x80] sm:$0xff] }
 0x371   : > { %1360 = vmatprep.mubr.f32.mxu0 %v941_v16  ;;  %v957_v16 = vld [vmem:[%s3573_s5 + $0x98] sm:$0xff] }
 0x372   : > { %1131 = vmatmul.mubr.f32.vlgmr.msra.gmra.mrb[2].mxu1 %v1002_v23  ;;  %v1018_v23 = vld [vmem:[#allocation3 + $0x80] sm:$0xff] }
 0x373   : > { %1135 = vmatprep.mubr.f32.mxu1 %v1005_v27  ;;  %v1021_v27 = vld [vmem:[#allocation3 + $0x98] sm:$0xff] }
 0x374   : > { %1361 = vmatmul.mubr.f32.gmra.mrb[4].mxu0 %v940_v0  ;;  %v956_v0 = vld [vmem:[%s3573_s5 + $0x90] sm:$0xff] }
 0x375   : > { %1365 = vmatprep.mubr.f32.mxu0 %v943_v39  ;;  %v959_v39 = vld [vmem:[%s3573_s5 + $0xa8] sm:$0xff] }
 0x376   : > { %1136 = vmatmul.mubr.f32.gmra.mrb[4].mxu1 %v1004_v31  ;;  %v1020_v31 = vld [vmem:[#allocation3 + $0x90] sm:$0xff] }
 0x377   : > { %1140 = vmatprep.mubr.f32.mxu1 %v1007_v33  ;;  %v1023_v33 = vld [vmem:[#allocation3 + $0xa8] sm:$0xff] }
 0x378   : > { %1366 = vmatmul.mubr.f32.gmra.mrb[6].mxu0 %v942_v35  ;;  %v958_v35 = vld [vmem:[%s3573_s5 + $0xa0] sm:$0xff] }
 0x379   : > { %1370 = vmatprep.mubr.f32.mxu0 %v945_v46  ;;  %v961_v46 = vld [vmem:[%s3573_s5 + $0xb8] sm:$0xff] }
 0x37a   : > { %1141 = vmatmul.mubr.f32.gmra.mrb[6].mxu1 %v1006_v37  ;;  %v1022_v37 = vld [vmem:[#allocation3 + $0xa0] sm:$0xff] }
 0x37b   : > { %1145 = vmatprep.mubr.f32.mxu1 %v1009_v40  ;;  %v1025_v40 = vld [vmem:[#allocation3 + $0xb8] sm:$0xff] }
 0x37c   : > { %1371 = vmatmul.mubr.f32.gmra.mrb[8].mxu0 %v944_v41  ;;  %v960_v41 = vld [vmem:[%s3573_s5 + $0xb0] sm:$0xff] }
 0x37d   : > { %1375 = vmatprep.mubr.f32.mxu0 %v947_v57  ;;  %v963_v57 = vld [vmem:[%s3573_s5 + $0xc8] sm:$0xff] }
 0x37e   : > { %1146 = vmatmul.mubr.f32.gmra.mrb[8].mxu1 %v1008_v43  ;;  %v1024_v43 = vld [vmem:[#allocation3 + $0xb0] sm:$0xff] }
 0x37f   : > { %1150 = vmatprep.mubr.f32.mxu1 %v1011_v47  ;;  %v1027_v47 = vld [vmem:[#allocation3 + $0xc8] sm:$0xff] }
 0x380   : > { %1376 = vmatmul.mubr.f32.gmra.mrb[10].mxu0 %v946_v49  ;;  %v962_v49 = vld [vmem:[%s3573_s5 + $0xc0] sm:$0xff] }
 0x381   : > { %1380 = vmatprep.mubr.f32.mxu0 %v949_v2  ;;  %v965_v2 = vld [vmem:[%s3573_s5 + $0xd8] sm:$0xff] }
 0x382   : > { %1151 = vmatmul.mubr.f32.gmra.mrb[10].mxu1 %v1010_v53  ;;  %v1026_v53 = vld [vmem:[#allocation3 + $0xc0] sm:$0xff] }
 0x383   : > { %1155 = vmatprep.mubr.f32.mxu1 %v1013_v54  ;;  %v1029_v54 = vld [vmem:[#allocation3 + $0xd8] sm:$0xff] }
 0x384   : > { %1381 = vmatmul.mubr.f32.gmra.mrb[12].mxu0 %v948_v59  ;;  %v964_v59 = vld [vmem:[%s3573_s5 + $0xd0] sm:$0xff] }
 0x385   : > { %1385 = vmatprep.mubr.f32.mxu0 %v951_v32  ;;  %v967_v32 = vld [vmem:[%s3573_s5 + $0xe8] sm:$0xff] }
 0x386   : > { %1156 = vmatmul.mubr.f32.gmra.mrb[12].mxu1 %v1012_v8  ;;  %v1028_v8 = vld [vmem:[#allocation3 + $0xd0] sm:$0xff] }
 0x387   : > { %1160 = vmatprep.mubr.f32.mxu1 %v1015_v63  ;;  %v1031_v63 = vld [vmem:[#allocation3 + $0xe8] sm:$0xff] }
 0x388   : > { %1386 = vmatmul.mubr.f32.gmra.mrb[14].mxu0 %v950_v4  ;;  %v966_v4 = vld [vmem:[%s3573_s5 + $0xe0] sm:$0xff] }
 0x389   : > { %1390 = vmatprep.mubr.f32.mxu0 %v953_v22  ;;  %v969_v22 = vld [vmem:[%s3573_s5 + $0xf8] sm:$0xff] }
 0x38a   : > { %1161 = vmatmul.mubr.f32.gmra.mrb[14].mxu1 %v1014_v17  ;;  %v1030_v17 = vld [vmem:[#allocation3 + $0xe0] sm:$0xff] }
 0x38b   : > { %1165 = vmatprep.mubr.f32.mxu1 %v1017_v51  ;;  %v1033_v51 = vld [vmem:[#allocation3 + $0xf8] sm:$0xff] }
 0x38c   : > { %1391 = vmatmul.mubr.f32.gmra.mrb[16].mxu0 %v952_v19  ;;  %v968_v19 = vld [vmem:[%s3573_s5 + $0xf0] sm:$0xff] }
 0x38d   : > { %1395 = vmatprep.mubr.f32.mxu0 %v955_v6  ;;  %v971_v6 = vld [vmem:[%s3573_s5 + $0x108] sm:$0xff] }
 0x38e   : > { %1166 = vmatmul.mubr.f32.gmra.mrb[16].mxu1 %v1016_v11  ;;  %v1032_v11 = vld [vmem:[#allocation3 + $0xf0] sm:$0xff] }
 0x38f   : > { %1170 = vmatprep.mubr.f32.mxu1 %v1019_v12  ;;  %v1035_v12 = vld [vmem:[#allocation3 + $0x108] sm:$0xff] }
 0x390   : > { %1396 = vmatmul.mubr.f32.gmra.mrb[18].mxu0 %v954_v28  ;;  %v970_v28 = vld [vmem:[%s3573_s5 + $0x100] sm:$0xff] }
 0x391   : > { %1400 = vmatprep.mubr.f32.mxu0 %v957_v16  ;;  %v973_v16 = vld [vmem:[%s3573_s5 + $0x118] sm:$0xff] }
 0x392   : > { %1171 = vmatmul.mubr.f32.gmra.mrb[18].mxu1 %v1018_v23  ;;  %v1034_v23 = vld [vmem:[#allocation3 + $0x100] sm:$0xff] }
 0x393   : > { %1175 = vmatprep.mubr.f32.mxu1 %v1021_v27  ;;  %v1037_v27 = vld [vmem:[#allocation3 + $0x118] sm:$0xff] }
 0x394   : > { %1401 = vmatmul.mubr.f32.gmra.mrb[20].mxu0 %v956_v0  ;;  %v972_v0 = vld [vmem:[%s3573_s5 + $0x110] sm:$0xff] }
 0x395   : > { %1405 = vmatprep.mubr.f32.mxu0 %v959_v39  ;;  %v975_v39 = vld [vmem:[%s3573_s5 + $0x128] sm:$0xff] }
 0x396   : > { %1176 = vmatmul.mubr.f32.gmra.mrb[20].mxu1 %v1020_v31  ;;  %v1036_v31 = vld [vmem:[#allocation3 + $0x110] sm:$0xff] }
 0x397   : > { %1180 = vmatprep.mubr.f32.mxu1 %v1023_v33  ;;  %v1039_v33 = vld [vmem:[#allocation3 + $0x128] sm:$0xff] }
 0x398   : > { %1406 = vmatmul.mubr.f32.gmra.mrb[22].mxu0 %v958_v35  ;;  %v974_v35 = vld [vmem:[%s3573_s5 + $0x120] sm:$0xff] }
 0x399   : > { %1410 = vmatprep.mubr.f32.mxu0 %v961_v46  ;;  %v977_v46 = vld [vmem:[%s3573_s5 + $0x138] sm:$0xff] }
 0x39a   : > { %1181 = vmatmul.mubr.f32.gmra.mrb[22].mxu1 %v1022_v37  ;;  %v1038_v37 = vld [vmem:[#allocation3 + $0x120] sm:$0xff] }
 0x39b   : > { %1185 = vmatprep.mubr.f32.mxu1 %v1025_v40  ;;  %v1041_v40 = vld [vmem:[#allocation3 + $0x138] sm:$0xff] }
 0x39c   : > { %1411 = vmatmul.mubr.f32.gmra.mrb[24].mxu0 %v960_v41  ;;  %v976_v41 = vld [vmem:[%s3573_s5 + $0x130] sm:$0xff] }
 0x39d   : > { %1415 = vmatprep.mubr.f32.mxu0 %v963_v57  ;;  %v979_v57 = vld [vmem:[%s3573_s5 + $0x148] sm:$0xff] }
 0x39e   : > { %1186 = vmatmul.mubr.f32.gmra.mrb[24].mxu1 %v1024_v43  ;;  %v1040_v43 = vld [vmem:[#allocation3 + $0x130] sm:$0xff] }
 0x39f   : > { %1190 = vmatprep.mubr.f32.mxu1 %v1027_v47  ;;  %v1043_v47 = vld [vmem:[#allocation3 + $0x148] sm:$0xff] }
 0x3a0   : > { %1416 = vmatmul.mubr.f32.gmra.mrb[26].mxu0 %v962_v49  ;;  %v978_v49 = vld [vmem:[%s3573_s5 + $0x140] sm:$0xff] }
 0x3a1   : > { %1420 = vmatprep.mubr.f32.mxu0 %v965_v2  ;;  %v981_v2 = vld [vmem:[%s3573_s5 + $0x158] sm:$0xff] }
 0x3a2   : > { %1191 = vmatmul.mubr.f32.gmra.mrb[26].mxu1 %v1026_v53  ;;  %v1042_v53 = vld [vmem:[#allocation3 + $0x140] sm:$0xff] }
 0x3a3   : > { %1195 = vmatprep.mubr.f32.mxu1 %v1029_v54  ;;  %v1045_v54 = vld [vmem:[#allocation3 + $0x158] sm:$0xff] }
 0x3a4   : > { %1421 = vmatmul.mubr.f32.gmra.mrb[28].mxu0 %v964_v59  ;;  %v980_v59 = vld [vmem:[%s3573_s5 + $0x150] sm:$0xff] }
 0x3a5   : > { %1425 = vmatprep.mubr.f32.mxu0 %v967_v32  ;;  %v983_v32 = vld [vmem:[%s3573_s5 + $0x168] sm:$0xff] }
 0x3a6   : > { %1196 = vmatmul.mubr.f32.gmra.mrb[28].mxu1 %v1028_v8  ;;  %v1044_v8 = vld [vmem:[#allocation3 + $0x150] sm:$0xff] }
 0x3a7   : > { %1200 = vmatprep.mubr.f32.mxu1 %v1031_v63  ;;  %v1047_v63 = vld [vmem:[#allocation3 + $0x168] sm:$0xff] }
 0x3a8   : > { %1426 = vmatmul.mubr.f32.gmra.mrb[30].mxu0 %v966_v4  ;;  %v982_v4 = vld [vmem:[%s3573_s5 + $0x160] sm:$0xff] }
 0x3a9   : > { %1430 = vmatprep.mubr.f32.mxu0 %v969_v22  ;;  %v985_v22 = vld [vmem:[%s3573_s5 + $0x178] sm:$0xff] }
 0x3aa   : > { %1201 = vmatmul.mubr.f32.gmra.mrb[30].mxu1 %v1030_v17  ;;  %v1046_v17 = vld [vmem:[#allocation3 + $0x160] sm:$0xff] }
 0x3ab   : > { %1205 = vmatprep.mubr.f32.mxu1 %v1033_v51  ;;  %v1049_v51 = vld [vmem:[#allocation3 + $0x178] sm:$0xff] }
 0x3ac   : > { %1431 = vmatmul.mubr.f32.gmra.mrb[32].mxu0 %v968_v19  ;;  %v984_v19 = vld [vmem:[%s3573_s5 + $0x170] sm:$0xff] }
 0x3ad   : > { %1435 = vmatprep.mubr.f32.mxu0 %v971_v6  ;;  %v987_v6 = vld [vmem:[%s3573_s5 + $0x188] sm:$0xff] }
 0x3ae   : > { %1206 = vmatmul.mubr.f32.gmra.mrb[32].mxu1 %v1032_v11  ;;  %v1048_v11 = vld [vmem:[#allocation3 + $0x170] sm:$0xff] }
 0x3af   : > { %1210 = vmatprep.mubr.f32.mxu1 %v1035_v12  ;;  %v1051_v12 = vld [vmem:[#allocation3 + $0x188] sm:$0xff] }
 0x3b0   : > { %1436 = vmatmul.mubr.f32.gmra.mrb[34].mxu0 %v970_v28  ;;  %v986_v28 = vld [vmem:[%s3573_s5 + $0x180] sm:$0xff] }
 0x3b1   : > { %1440 = vmatprep.mubr.f32.mxu0 %v973_v16  ;;  %v989_v16 = vld [vmem:[%s3573_s5 + $0x198] sm:$0xff] }
 0x3b2   : > { %1211 = vmatmul.mubr.f32.gmra.mrb[34].mxu1 %v1034_v23  ;;  %v1050_v23 = vld [vmem:[#allocation3 + $0x180] sm:$0xff] }
 0x3b3   : > { %1215 = vmatprep.mubr.f32.mxu1 %v1037_v27  ;;  %v1053_v27 = vld [vmem:[#allocation3 + $0x198] sm:$0xff] }
 0x3b4   : > { %1441 = vmatmul.mubr.f32.gmra.mrb[36].mxu0 %v972_v0  ;;  %v988_v0 = vld [vmem:[%s3573_s5 + $0x190] sm:$0xff] }
 0x3b5   : > { %1445 = vmatprep.mubr.f32.mxu0 %v975_v39  ;;  %v991_v39 = vld [vmem:[%s3573_s5 + $0x1a8] sm:$0xff] }
 0x3b6   : > { %1216 = vmatmul.mubr.f32.gmra.mrb[36].mxu1 %v1036_v31  ;;  %v1052_v31 = vld [vmem:[#allocation3 + $0x190] sm:$0xff] }
 0x3b7   : > { %1220 = vmatprep.mubr.f32.mxu1 %v1039_v33  ;;  %v1055_v33 = vld [vmem:[#allocation3 + $0x1a8] sm:$0xff] }
 0x3b8   : > { %1446 = vmatmul.mubr.f32.gmra.mrb[38].mxu0 %v974_v35  ;;  %v990_v35 = vld [vmem:[%s3573_s5 + $0x1a0] sm:$0xff] }
 0x3b9   : > { %1450 = vmatprep.mubr.f32.mxu0 %v977_v46  ;;  %v993_v46 = vld [vmem:[%s3573_s5 + $0x1b8] sm:$0xff] }
 0x3ba   : > { %1221 = vmatmul.mubr.f32.gmra.mrb[38].mxu1 %v1038_v37  ;;  %v1054_v37 = vld [vmem:[#allocation3 + $0x1a0] sm:$0xff] }
 0x3bb   : > { %1225 = vmatprep.mubr.f32.mxu1 %v1041_v40  ;;  %v1057_v40 = vld [vmem:[#allocation3 + $0x1b8] sm:$0xff] }
 0x3bc   : > { %1451 = vmatmul.mubr.f32.gmra.mrb[40].mxu0 %v976_v41  ;;  %v992_v41 = vld [vmem:[%s3573_s5 + $0x1b0] sm:$0xff] }
 0x3bd   : > { %1455 = vmatprep.mubr.f32.mxu0 %v979_v57  ;;  %v995_v57 = vld [vmem:[%s3573_s5 + $0x1c8] sm:$0xff] }
 0x3be   : > { %1226 = vmatmul.mubr.f32.gmra.mrb[40].mxu1 %v1040_v43  ;;  %v1056_v43 = vld [vmem:[#allocation3 + $0x1b0] sm:$0xff] }
 0x3bf   : > { %1230 = vmatprep.mubr.f32.mxu1 %v1043_v47  ;;  %v1059_v47 = vld [vmem:[#allocation3 + $0x1c8] sm:$0xff] }
 0x3c0   : > { %1456 = vmatmul.mubr.f32.gmra.mrb[42].mxu0 %v978_v49  ;;  %v994_v49 = vld [vmem:[%s3573_s5 + $0x1c0] sm:$0xff] }
 0x3c1   : > { %1460 = vmatprep.mubr.f32.mxu0 %v981_v2  ;;  %v997_v2 = vld [vmem:[%s3573_s5 + $0x1d8] sm:$0xff] }
 0x3c2   : > { %1231 = vmatmul.mubr.f32.gmra.mrb[42].mxu1 %v1042_v53  ;;  %v1058_v53 = vld [vmem:[#allocation3 + $0x1c0] sm:$0xff] }
 0x3c3   : > { %1235 = vmatprep.mubr.f32.mxu1 %v1045_v54  ;;  %v1061_v54 = vld [vmem:[#allocation3 + $0x1d8] sm:$0xff] }
 0x3c4   : > { %1461 = vmatmul.mubr.f32.gmra.mrb[44].mxu0 %v980_v59  ;;  %v996_v59 = vld [vmem:[%s3573_s5 + $0x1d0] sm:$0xff] }
 0x3c5   : > { %1465 = vmatprep.mubr.f32.mxu0 %v983_v32  ;;  %v999_v32 = vld [vmem:[%s3573_s5 + $0x1e8] sm:$0xff] }
 0x3c6   : > { %1236 = vmatmul.mubr.f32.gmra.mrb[44].mxu1 %v1044_v8  ;;  %v1060_v8 = vld [vmem:[#allocation3 + $0x1d0] sm:$0xff] }
 0x3c7   : > { %1240 = vmatprep.mubr.f32.mxu1 %v1047_v63  ;;  %v1063_v63 = vld [vmem:[#allocation3 + $0x1e8] sm:$0xff] }
 0x3c8   : > { %1466 = vmatmul.mubr.f32.gmra.mrb[46].mxu0 %v982_v4  ;;  %v998_v4 = vld [vmem:[%s3573_s5 + $0x1e0] sm:$0xff] }
 0x3c9   : > { %1470 = vmatprep.mubr.f32.mxu0 %v985_v22  ;;  %v1001_v22 = vld [vmem:[%s3573_s5 + $0x1f8] sm:$0xff] }
 0x3ca   : > { %1241 = vmatmul.mubr.f32.gmra.mrb[46].mxu1 %v1046_v17  ;;  %v1062_v17 = vld [vmem:[#allocation3 + $0x1e0] sm:$0xff] }
 0x3cb   : > { %1245 = vmatprep.mubr.f32.mxu1 %v1049_v51  ;;  %v1065_v51 = vld [vmem:[#allocation3 + $0x1f8] sm:$0xff] }
 0x3cc   : > { %1471 = vmatmul.mubr.f32.gmra.mrb[48].mxu0 %v984_v19  ;;  %v1000_v19 = vld [vmem:[%s3573_s5 + $0x1f0] sm:$0xff] }
 0x3cd   : > { %1475 = vmatprep.mubr.f32.mxu0 %v987_v6  ;;  %v1064_v6 = vld [vmem:[#allocation3 + $0x1f0] sm:$0xff] }
 0x3ce   : > { %1246 = vmatmul.mubr.f32.gmra.mrb[48].mxu1 %v1048_v11  ;;  %v2553_v11 = vmov 0  }
 0x3cf   : > { %1250 = vmatprep.mubr.f32.mxu1 %v1051_v12  ;;  %2317 = vset.pattern.permute.xlu0 %v2553_v11 }
 0x3d0   : > { %1476 = vmatmul.mubr.f32.gmra.mrb[50].mxu0 %v986_v28  ;;  %2318 = vset.pattern.permute.xlu1 %v2553_v11 }
 0x3d1   : > { %1480 = vmatprep.mubr.f32.mxu0 %v989_v16 }
 0x3d2   : > { %1251 = vmatmul.mubr.f32.gmra.mrb[50].mxu1 %v1050_v23  ;;  %v3423_v23 = vstv %s1516_s27 }
 0x3d3   : > { %1255 = vmatprep.mubr.f32.mxu1 %v1053_v27 }
 0x3d4   : > { %1481 = vmatmul.mubr.f32.gmra.mrb[52].mxu0 %v988_v0 }
 0x3d5   : > { %1485 = vmatprep.mubr.f32.mxu0 %v991_v39 }
 0x3d6   : > { %1256 = vmatmul.mubr.f32.gmra.mrb[52].mxu1 %v1052_v31 }
 0x3d7   : > { %1260 = vmatprep.mubr.f32.mxu1 %v1055_v33 }
 0x3d8   : > { %1486 = vmatmul.mubr.f32.gmra.mrb[54].mxu0 %v990_v35 }
 0x3d9   : > { %1490 = vmatprep.mubr.f32.mxu0 %v993_v46 }
 0x3da   : > { %1261 = vmatmul.mubr.f32.gmra.mrb[54].mxu1 %v1054_v37 }
 0x3db   : > { %1265 = vmatprep.mubr.f32.mxu1 %v1057_v40 }
 0x3dc   : > { %1491 = vmatmul.mubr.f32.gmra.mrb[56].mxu0 %v992_v41 }
 0x3dd   : > { %1495 = vmatprep.mubr.f32.mxu0 %v995_v57 }
 0x3de   : > { %1266 = vmatmul.mubr.f32.gmra.mrb[56].mxu1 %v1056_v43 }
 0x3df   : > { %1270 = vmatprep.mubr.f32.mxu1 %v1059_v47 }
 0x3e0   : > { %1496 = vmatmul.mubr.f32.gmra.mrb[58].mxu0 %v994_v49 }
 0x3e1   : > { %1500 = vmatprep.mubr.f32.mxu0 %v997_v2 }
 0x3e2   : > { %1271 = vmatmul.mubr.f32.gmra.mrb[58].mxu1 %v1058_v53 }
 0x3e3   : > { %1275 = vmatprep.mubr.f32.mxu1 %v1061_v54 }
 0x3e4   : > { %1501 = vmatmul.mubr.f32.gmra.mrb[60].mxu0 %v996_v59 }
 0x3e5   : > { %1505 = vmatprep.mubr.f32.mxu0 %v999_v32 }
 0x3e6   : > { %1276 = vmatmul.mubr.f32.gmra.mrb[60].mxu1 %v1060_v8 }
 0x3e7   : > { %1280 = vmatprep.mubr.f32.mxu1 %v1063_v63 }
 0x3e8   : > { %1506 = vmatmul.mubr.f32.gmra.mrb[62].mxu0 %v998_v4 }
 0x3e9   : > { %1510 = vmatprep.mubr.f32.mxu0 %v1001_v22 }
 0x3ea   : > { %1281 = vmatmul.mubr.f32.gmra.mrb[62].mxu1 %v1062_v17 }
 0x3eb   : > { %1285 = vmatprep.mubr.f32.mxu1 %v1065_v51 }
 0x3ec   : > { %1511 = vmatmul.mubr.f32.gmra.mrb[64].mxu0 %v1000_v19 }
 0x3ee   : > { %1286 = vmatmul.mubr.f32.gmra.mrb[64].mxu1 %v1064_v6 }
 0x443   : > { %v1357_v12 = vpop.f32.mrb[2].mxu0 }
 0x444   : > { %v1359_v28 = vpop.f32.mrb[3].mxu0 }
 0x445   : > { %v1132_v16 = vpop.f32.mrb[2].mxu1 }
 0x446   : > { %v1358_v27 = vadd.f32 %v1357_v12, %v1132_v16  ;;  %v1134_v0 = vpop.f32.mrb[3].mxu1 }
 0x447   : > { %v1362_v39 = vpop.f32.mrb[4].mxu0 }
 0x448   : > { %v1518_v31 = vadd.f32 %v3423_v23, %v1358_v27  ;;  %v1364_v33 = vpop.f32.mrb[5].mxu0 }
 0x449   : > { %v1137_v35 = vpop.f32.mrb[4].mxu1 }
 0x44a   : > { %v2100_v46 = vmul.f32 -1.442695, %v1518_v31  ;;  %v1363_v37 = vadd.f32 %v1362_v39, %v1137_v35  ;;  %v1139_v40 = vpop.f32.mrb[5].mxu1 }
 0x44b   : > { %v1367_v41 = vpop.f32.mrb[6].mxu0 }
 0x44c   : > { %2323 = vpow2.f32 %v2100_v46  ;;  %v1519_v57 = vadd.f32 %v3423_v23, %v1363_v37  ;;  %v1369_v43 = vpop.f32.mrb[7].mxu0 }
 0x44d   : > { %v1142_v47 = vpop.f32.mrb[6].mxu1 }
 0x44e   : > { %v2101_v49 = vmul.f32 -1.442695, %v1519_v57  ;;  %v1368_v2 = vadd.f32 %v1367_v41, %v1142_v47  ;;  %v1144_v53 = vpop.f32.mrb[7].mxu1 }
 0x44f   : > { %v1372_v54 = vpop.f32.mrb[8].mxu0 }
 0x450   : > { %2325 = vpow2.f32 %v2101_v49  ;;  %v1520_v59 = vadd.f32 %v3423_v23, %v1368_v2  ;;  %v1374_v32 = vpop.f32.mrb[9].mxu0 }
 0x451   : > { %v1147_v8 = vpop.f32.mrb[8].mxu1 }
 0x452   : > { %v2102_v63 = vmul.f32 -1.442695, %v1520_v59  ;;  %v1373_v4 = vadd.f32 %v1372_v54, %v1147_v8  ;;  %v1149_v22 = vpop.f32.mrb[9].mxu1 }
 0x453   : > { %v1377_v17 = vpop.f32.mrb[10].mxu0 }
 0x454   : > { %2327 = vpow2.f32 %v2102_v63  ;;  %v1521_v51 = vadd.f32 %v3423_v23, %v1373_v4  ;;  %v1379_v19 = vpop.f32.mrb[11].mxu0 }
 0x455   : > { %v1152_v6 = vpop.f32.mrb[10].mxu1 }
 0x456   : > { %v2324_v11 = vpop.eup %2323  ;;  %v2103_v12 = vmul.f32 -1.442695, %v1521_v51  ;;  %v1378_v28 = vadd.f32 %v1377_v17, %v1152_v6  ;;  %v1154_v16 = vpop.f32.mrb[11].mxu1 }
 0x457   : > { %v1646_v27 = vadd.f32 1.0, %v2324_v11  ;;  %v1382_v0 = vpop.f32.mrb[12].mxu0 }
 0x458   : > { %2329 = vpow2.f32 %v2103_v12  ;;  %v1522_v39 = vadd.f32 %v3423_v23, %v1378_v28  ;;  %v1384_v31 = vpop.f32.mrb[13].mxu0 }
 0x459   : > { %2331 = vrcp.f32 %v1646_v27  ;;  %v1157_v33 = vpop.f32.mrb[12].mxu1 }
 0x45a   : > { %v2326_v35 = vpop.eup %2325  ;;  %v2104_v46 = vmul.f32 -1.442695, %v1522_v39  ;;  %v1383_v37 = vadd.f32 %v1382_v0, %v1157_v33  ;;  %v1159_v40 = vpop.f32.mrb[13].mxu1 }
 0x45b   : > { %v1647_v41 = vadd.f32 1.0, %v2326_v35  ;;  %v1387_v57 = vpop.f32.mrb[14].mxu0 }
 0x45c   : > { %2333 = vpow2.f32 %v2104_v46  ;;  %v1523_v43 = vadd.f32 %v3423_v23, %v1383_v37  ;;  %v1389_v47 = vpop.f32.mrb[15].mxu0 }
 0x45d   : > { %2335 = vrcp.f32 %v1647_v41  ;;  %v1162_v49 = vpop.f32.mrb[14].mxu1 }
 0x45e   : > { %v2328_v2 = vpop.eup %2327  ;;  %v2105_v53 = vmul.f32 -1.442695, %v1523_v43  ;;  %v1388_v54 = vadd.f32 %v1387_v57, %v1162_v49  ;;  %v1164_v59 = vpop.f32.mrb[15].mxu1 }
 0x45f   : > { %v1648_v32 = vadd.f32 1.0, %v2328_v2  ;;  %v1392_v8 = vpop.f32.mrb[16].mxu0 }
 0x460   : > { %2337 = vpow2.f32 %v2105_v53  ;;  %v1524_v63 = vadd.f32 %v3423_v23, %v1388_v54  ;;  %v1394_v4 = vpop.f32.mrb[17].mxu0 }
 0x461   : > { %2339 = vrcp.f32 %v1648_v32  ;;  %v1167_v22 = vpop.f32.mrb[16].mxu1 }
 0x462   : > { %v2330_v17 = vpop.eup %2329  ;;  %v2106_v51 = vmul.f32 -1.442695, %v1524_v63  ;;  %v1393_v19 = vadd.f32 %v1392_v8, %v1167_v22  ;;  %v1169_v6 = vpop.f32.mrb[17].mxu1 }
 0x463   : > { %v2332_v11 = vpop.eup %2331  ;;  %v1649_v12 = vadd.f32 1.0, %v2330_v17  ;;  %v1397_v28 = vpop.f32.mrb[18].mxu0 }
 0x464   : > { %2341 = vpow2.f32 %v2106_v51  ;;  %v1525_v16 = vadd.f32 %v3423_v23, %v1393_v19  ;;  %1744 = vperm.xlu0 %2317, %v2332_v11   ;;  %v1399_v27 = vpop.f32.mrb[19].mxu0 }
 0x465   : > { %2343 = vrcp.f32 %v1649_v12  ;;  %v1172_v0 = vpop.f32.mrb[18].mxu1 }
 0x466   : > { %v2334_v39 = vpop.eup %2333  ;;  %v2107_v31 = vmul.f32 -1.442695, %v1525_v16  ;;  %v1398_v33 = vadd.f32 %v1397_v28, %v1172_v0  ;;  %v1174_v35 = vpop.f32.mrb[19].mxu1 }
 0x467   : > { %v2336_v46 = vpop.eup %2335  ;;  %v1650_v37 = vadd.f32 1.0, %v2334_v39  ;;  %v1402_v40 = vpop.f32.mrb[20].mxu0 }
 0x468   : > { %2345 = vpow2.f32 %v2107_v31  ;;  %v1526_v41 = vadd.f32 %v3423_v23, %v1398_v33  ;;  %1749 = vperm.xlu1 %2318, %v2336_v46   ;;  %v1404_v57 = vpop.f32.mrb[21].mxu0 }
 0x469   : > { %2347 = vrcp.f32 %v1650_v37  ;;  %v1177_v43 = vpop.f32.mrb[20].mxu1 }
 0x46a   : > { %v2338_v47 = vpop.eup %2337  ;;  %v2108_v49 = vmul.f32 -1.442695, %v1526_v41  ;;  %v1403_v2 = vadd.f32 %v1402_v40, %v1177_v43  ;;  %v1179_v53 = vpop.f32.mrb[21].mxu1 }
 0x46b   : > { %v2340_v54 = vpop.eup %2339  ;;  %v1651_v59 = vadd.f32 1.0, %v2338_v47  ;;  %v1407_v32 = vpop.f32.mrb[22].mxu0 }
 0x46c   : > { %2349 = vpow2.f32 %v2108_v49  ;;  %v1527_v8 = vadd.f32 %v3423_v23, %v1403_v2  ;;  %1754 = vperm.xlu1 %2318, %v2340_v54   ;;  %v1409_v63 = vpop.f32.mrb[23].mxu0 }
 0x46d   : > { %2351 = vrcp.f32 %v1651_v59  ;;  %v1182_v4 = vpop.f32.mrb[22].mxu1 }
 0x46e   : > { %v2342_v22 = vpop.eup %2341  ;;  %v2109_v17 = vmul.f32 -1.442695, %v1527_v8  ;;  %v1408_v51 = vadd.f32 %v1407_v32, %v1182_v4  ;;  %v1184_v19 = vpop.f32.mrb[23].mxu1 }
 0x46f   : > { %v2344_v6 = vpop.eup %2343  ;;  %v1652_v11 = vadd.f32 1.0, %v2342_v22  ;;  %v1412_v12 = vpop.f32.mrb[24].mxu0 }
 0x470   : > { %2353 = vpow2.f32 %v2109_v17  ;;  %v1528_v28 = vadd.f32 %v3423_v23, %v1408_v51  ;;  %1759 = vperm.xlu1 %2318, %v2344_v6   ;;  %v1414_v16 = vpop.f32.mrb[25].mxu0 }
 0x471   : > { %2355 = vrcp.f32 %v1652_v11  ;;  %v1187_v27 = vpop.f32.mrb[24].mxu1 }
 0x472   : > { %v2346_v0 = vpop.eup %2345  ;;  %v2110_v39 = vmul.f32 -1.442695, %v1528_v28  ;;  %v1413_v31 = vadd.f32 %v1412_v12, %v1187_v27  ;;  %v1189_v33 = vpop.f32.mrb[25].mxu1 }
 0x473   : > { %v2348_v35 = vpop.eup %2347  ;;  %v1653_v46 = vadd.f32 1.0, %v2346_v0  ;;  %v1417_v37 = vpop.f32.mrb[26].mxu0 }
 0x474   : > { %2357 = vpow2.f32 %v2110_v39  ;;  %v1529_v40 = vadd.f32 %v3423_v23, %v1413_v31  ;;  %1764 = vperm.xlu1 %2318, %v2348_v35   ;;  %v1419_v41 = vpop.f32.mrb[27].mxu0 }
 0x475   : > { %2359 = vrcp.f32 %v1653_v46  ;;  %v1192_v57 = vpop.f32.mrb[26].mxu1 }
 0x476   : > { %v2350_v43 = vpop.eup %2349  ;;  %v2111_v47 = vmul.f32 -1.442695, %v1529_v40  ;;  %v1418_v49 = vadd.f32 %v1417_v37, %v1192_v57  ;;  %v1194_v2 = vpop.f32.mrb[27].mxu1 }
 0x477   : > { %v2352_v53 = vpop.eup %2351  ;;  %v1654_v54 = vadd.f32 1.0, %v2350_v43  ;;  %v1422_v59 = vpop.f32.mrb[28].mxu0 }
 0x478   : > { %2361 = vpow2.f32 %v2111_v47  ;;  %v1530_v32 = vadd.f32 %v3423_v23, %v1418_v49  ;;  %1769 = vperm.xlu1 %2318, %v2352_v53   ;;  %v1424_v8 = vpop.f32.mrb[29].mxu0 }
 0x479   : > { %2363 = vrcp.f32 %v1654_v54  ;;  %v1197_v63 = vpop.f32.mrb[28].mxu1 }
 0x47a   : > { %v2354_v4 = vpop.eup %2353  ;;  %v2112_v22 = vmul.f32 -1.442695, %v1530_v32  ;;  %v1423_v17 = vadd.f32 %v1422_v59, %v1197_v63  ;;  %v1199_v51 = vpop.f32.mrb[29].mxu1 }
 0x47b   : > { %v2356_v19 = vpop.eup %2355  ;;  %v1655_v6 = vadd.f32 1.0, %v2354_v4  ;;  %v1427_v11 = vpop.f32.mrb[30].mxu0 }
 0x47c   : > { %2365 = vpow2.f32 %v2112_v22  ;;  %v1531_v12 = vadd.f32 %v3423_v23, %v1423_v17  ;;  %1774 = vperm.xlu1 %2318, %v2356_v19   ;;  %v1429_v28 = vpop.f32.mrb[31].mxu0 }
 0x47d   : > { %2367 = vrcp.f32 %v1655_v6  ;;  %v1202_v16 = vpop.f32.mrb[30].mxu1 }
 0x47e   : > { %v2358_v27 = vpop.eup %2357  ;;  %v2113_v0 = vmul.f32 -1.442695, %v1531_v12  ;;  %v1428_v39 = vadd.f32 %v1427_v11, %v1202_v16  ;;  %v1204_v31 = vpop.f32.mrb[31].mxu1 }
 0x47f   : > { %v2360_v33 = vpop.eup %2359  ;;  %v1656_v35 = vadd.f32 1.0, %v2358_v27  ;;  %v1432_v46 = vpop.f32.mrb[32].mxu0 }
 0x480   : > { %2369 = vpow2.f32 %v2113_v0  ;;  %v1532_v37 = vadd.f32 %v3423_v23, %v1428_v39  ;;  %1779 = vperm.xlu1 %2318, %v2360_v33   ;;  %v1434_v40 = vpop.f32.mrb[33].mxu0 }
 0x481   : > { %2371 = vrcp.f32 %v1656_v35  ;;  %v1207_v41 = vpop.f32.mrb[32].mxu1 }
 0x482   : > { %v2362_v57 = vpop.eup %2361  ;;  %v2114_v43 = vmul.f32 -1.442695, %v1532_v37  ;;  %v1433_v47 = vadd.f32 %v1432_v46, %v1207_v41  ;;  %v1209_v49 = vpop.f32.mrb[33].mxu1 }
 0x483   : > { %v2364_v2 = vpop.eup %2363  ;;  %v1657_v53 = vadd.f32 1.0, %v2362_v57  ;;  %v1437_v54 = vpop.f32.mrb[34].mxu0 }
 0x484   : > { %2373 = vpow2.f32 %v2114_v43  ;;  %v1533_v59 = vadd.f32 %v3423_v23, %v1433_v47  ;;  %1784 = vperm.xlu1 %2318, %v2364_v2   ;;  %v1439_v32 = vpop.f32.mrb[35].mxu0 }
 0x485   : > { %2375 = vrcp.f32 %v1657_v53  ;;  %v1212_v8 = vpop.f32.mrb[34].mxu1 }
 0x486   : > { %v2366_v63 = vpop.eup %2365  ;;  %v2115_v4 = vmul.f32 -1.442695, %v1533_v59  ;;  %v1438_v22 = vadd.f32 %v1437_v54, %v1212_v8  ;;  %v1214_v17 = vpop.f32.mrb[35].mxu1 }
 0x487   : > { %v2368_v51 = vpop.eup %2367  ;;  %v1658_v19 = vadd.f32 1.0, %v2366_v63  ;;  %v1442_v6 = vpop.f32.mrb[36].mxu0 }
 0x488   : > { %2377 = vpow2.f32 %v2115_v4  ;;  %v1534_v11 = vadd.f32 %v3423_v23, %v1438_v22  ;;  %1789 = vperm.xlu0 %2317, %v2368_v51   ;;  %v1444_v12 = vpop.f32.mrb[37].mxu0 }
 0x489   : > { %2379 = vrcp.f32 %v1658_v19  ;;  %v1217_v28 = vpop.f32.mrb[36].mxu1 }
 0x48a   : > { %v2370_v16 = vpop.eup %2369  ;;  %v2116_v27 = vmul.f32 -1.442695, %v1534_v11  ;;  %v1443_v0 = vadd.f32 %v1442_v6, %v1217_v28  ;;  %v1219_v39 = vpop.f32.mrb[37].mxu1 }
 0x48b   : > { %v2372_v31 = vpop.eup %2371  ;;  %v1659_v33 = vadd.f32 1.0, %v2370_v16  ;;  %v1447_v35 = vpop.f32.mrb[38].mxu0 }
 0x48c   : > { %2381 = vpow2.f32 %v2116_v27  ;;  %v1535_v46 = vadd.f32 %v3423_v23, %v1443_v0  ;;  %1794 = vperm.xlu1 %2318, %v2372_v31   ;;  %v1449_v37 = vpop.f32.mrb[39].mxu0 }
 0x48d   : > { %2383 = vrcp.f32 %v1659_v33  ;;  %v1222_v40 = vpop.f32.mrb[38].mxu1 }
 0x48e   : > { %v2374_v41 = vpop.eup %2373  ;;  %v2117_v57 = vmul.f32 -1.442695, %v1535_v46  ;;  %v1448_v43 = vadd.f32 %v1447_v35, %v1222_v40  ;;  %v1224_v47 = vpop.f32.mrb[39].mxu1 }
 0x48f   : > { %v2376_v49 = vpop.eup %2375  ;;  %v1660_v2 = vadd.f32 1.0, %v2374_v41  ;;  %v1452_v53 = vpop.f32.mrb[40].mxu0 }
 0x490   : > { %2385 = vpow2.f32 %v2117_v57  ;;  %v1536_v54 = vadd.f32 %v3423_v23, %v1448_v43  ;;  %1799 = vperm.xlu0 %2317, %v2376_v49   ;;  %v1454_v59 = vpop.f32.mrb[41].mxu0 }
 0x491   : > { %2387 = vrcp.f32 %v1660_v2  ;;  %v1227_v32 = vpop.f32.mrb[40].mxu1 }
 0x492   : > { %v2378_v8 = vpop.eup %2377  ;;  %v2118_v63 = vmul.f32 -1.442695, %v1536_v54  ;;  %v1453_v4 = vadd.f32 %v1452_v53, %v1227_v32  ;;  %v1229_v22 = vpop.f32.mrb[41].mxu1 }
 0x493   : > { %v2380_v17 = vpop.eup %2379  ;;  %v1661_v51 = vadd.f32 1.0, %v2378_v8  ;;  %v1457_v19 = vpop.f32.mrb[42].mxu0 }
 0x494   : > { %2389 = vpow2.f32 %v2118_v63  ;;  %v1537_v6 = vadd.f32 %v3423_v23, %v1453_v4  ;;  %1804 = vperm.xlu1 %2318, %v2380_v17   ;;  %v1459_v11 = vpop.f32.mrb[43].mxu0 }
 0x495   : > { %2391 = vrcp.f32 %v1661_v51  ;;  %v1232_v12 = vpop.f32.mrb[42].mxu1 }
 0x496   : > { %v2382_v28 = vpop.eup %2381  ;;  %v2119_v16 = vmul.f32 -1.442695, %v1537_v6  ;;  %v1458_v27 = vadd.f32 %v1457_v19, %v1232_v12  ;;  %v1234_v0 = vpop.f32.mrb[43].mxu1 }
 0x497   : > { %v2384_v39 = vpop.eup %2383  ;;  %v1662_v31 = vadd.f32 1.0, %v2382_v28  ;;  %v1462_v33 = vpop.f32.mrb[44].mxu0 }
 0x498   : > { %2393 = vpow2.f32 %v2119_v16  ;;  %v1538_v35 = vadd.f32 %v3423_v23, %v1458_v27  ;;  %1809 = vperm.xlu0 %2317, %v2384_v39   ;;  %v1464_v46 = vpop.f32.mrb[45].mxu0 }
 0x499   : > { %2395 = vrcp.f32 %v1662_v31  ;;  %v1237_v37 = vpop.f32.mrb[44].mxu1 }
 0x49a   : > { %v2386_v40 = vpop.eup %2385  ;;  %v2120_v41 = vmul.f32 -1.442695, %v1538_v35  ;;  %v1463_v57 = vadd.f32 %v1462_v33, %v1237_v37  ;;  %v1239_v43 = vpop.f32.mrb[45].mxu1 }
 0x49b   : > { %v2388_v47 = vpop.eup %2387  ;;  %v1663_v49 = vadd.f32 1.0, %v2386_v40  ;;  %v1467_v2 = vpop.f32.mrb[46].mxu0 }
 0x49c   : > { %2397 = vpow2.f32 %v2120_v41  ;;  %v1539_v53 = vadd.f32 %v3423_v23, %v1463_v57  ;;  %1814 = vperm.xlu1 %2318, %v2388_v47   ;;  %v1469_v54 = vpop.f32.mrb[47].mxu0 }
 0x49d   : > { %2399 = vrcp.f32 %v1663_v49  ;;  %v1242_v59 = vpop.f32.mrb[46].mxu1 }
 0x49e   : > { %v2390_v32 = vpop.eup %2389  ;;  %v2121_v8 = vmul.f32 -1.442695, %v1539_v53  ;;  %v1468_v63 = vadd.f32 %v1467_v2, %v1242_v59  ;;  %v1244_v4 = vpop.f32.mrb[47].mxu1 }
 0x49f   : > { %v2392_v22 = vpop.eup %2391  ;;  %v1664_v17 = vadd.f32 1.0, %v2390_v32  ;;  %v1472_v51 = vpop.f32.mrb[48].mxu0 }
 0x4a0   : > { %2401 = vpow2.f32 %v2121_v8  ;;  %v1540_v19 = vadd.f32 %v3423_v23, %v1468_v63  ;;  %1819 = vperm.xlu0 %2317, %v2392_v22   ;;  %v1474_v6 = vpop.f32.mrb[49].mxu0 }
 0x4a1   : > { %2403 = vrcp.f32 %v1664_v17  ;;  %v1247_v11 = vpop.f32.mrb[48].mxu1 }
 0x4a2   : > { %v2394_v12 = vpop.eup %2393  ;;  %v2122_v28 = vmul.f32 -1.442695, %v1540_v19  ;;  %v1473_v16 = vadd.f32 %v1472_v51, %v1247_v11  ;;  %v1249_v27 = vpop.f32.mrb[49].mxu1 }
 0x4a3   : > { %v2396_v0 = vpop.eup %2395  ;;  %v1665_v39 = vadd.f32 1.0, %v2394_v12  ;;  %v1477_v31 = vpop.f32.mrb[50].mxu0 }
 0x4a4   : > { %2405 = vpow2.f32 %v2122_v28  ;;  %v1541_v33 = vadd.f32 %v3423_v23, %v1473_v16  ;;  %1824 = vperm.xlu1 %2318, %v2396_v0   ;;  %v1479_v35 = vpop.f32.mrb[51].mxu0 }
 0x4a5   : > { %2407 = vrcp.f32 %v1665_v39  ;;  %v1252_v46 = vpop.f32.mrb[50].mxu1 }
 0x4a6   : > { %v2398_v37 = vpop.eup %2397  ;;  %v2123_v40 = vmul.f32 -1.442695, %v1541_v33  ;;  %v1478_v41 = vadd.f32 %v1477_v31, %v1252_v46  ;;  %v1254_v57 = vpop.f32.mrb[51].mxu1 }
 0x4a7   : > { %v2400_v43 = vpop.eup %2399  ;;  %v1666_v47 = vadd.f32 1.0, %v2398_v37  ;;  %v1482_v49 = vpop.f32.mrb[52].mxu0 }
 0x4a8   : > { %2409 = vpow2.f32 %v2123_v40  ;;  %v1542_v2 = vadd.f32 %v3423_v23, %v1478_v41  ;;  %1829 = vperm.xlu0 %2317, %v2400_v43   ;;  %v1484_v53 = vpop.f32.mrb[53].mxu0 }
 0x4a9   : > { %2411 = vrcp.f32 %v1666_v47  ;;  %v1257_v54 = vpop.f32.mrb[52].mxu1 }
 0x4aa   : > { %v2402_v59 = vpop.eup %2401  ;;  %v2124_v32 = vmul.f32 -1.442695, %v1542_v2  ;;  %v1483_v8 = vadd.f32 %v1482_v49, %v1257_v54  ;;  %v1259_v63 = vpop.f32.mrb[53].mxu1 }
 0x4ab   : > { %v2404_v4 = vpop.eup %2403  ;;  %v1667_v22 = vadd.f32 1.0, %v2402_v59  ;;  %v1487_v17 = vpop.f32.mrb[54].mxu0 }
 0x4ac   : > { %2413 = vpow2.f32 %v2124_v32  ;;  %v1543_v51 = vadd.f32 %v3423_v23, %v1483_v8  ;;  %1834 = vperm.xlu1 %2318, %v2404_v4   ;;  %v1489_v19 = vpop.f32.mrb[55].mxu0 }
 0x4ad   : > { %2415 = vrcp.f32 %v1667_v22  ;;  %v1262_v6 = vpop.f32.mrb[54].mxu1 }
 0x4ae   : > { %v2406_v11 = vpop.eup %2405  ;;  %v2125_v12 = vmul.f32 -1.442695, %v1543_v51  ;;  %v1488_v28 = vadd.f32 %v1487_v17, %v1262_v6  ;;  %v1264_v16 = vpop.f32.mrb[55].mxu1 }
 0x4af   : > { %v2408_v27 = vpop.eup %2407  ;;  %v1668_v0 = vadd.f32 1.0, %v2406_v11  ;;  %v1492_v39 = vpop.f32.mrb[56].mxu0 }
 0x4b0   : > { %2417 = vpow2.f32 %v2125_v12  ;;  %v1544_v31 = vadd.f32 %v3423_v23, %v1488_v28  ;;  %1839 = vperm.xlu0 %2317, %v2408_v27   ;;  %v1494_v33 = vpop.f32.mrb[57].mxu0 }
 0x4b1   : > { %2419 = vrcp.f32 %v1668_v0  ;;  %v1267_v35 = vpop.f32.mrb[56].mxu1 }
 0x4b2   : > { %v2410_v46 = vpop.eup %2409  ;;  %v2126_v37 = vmul.f32 -1.442695, %v1544_v31  ;;  %v1493_v40 = vadd.f32 %v1492_v39, %v1267_v35  ;;  %v1269_v41 = vpop.f32.mrb[57].mxu1 }
 0x4b3   : > { %v2412_v57 = vpop.eup %2411  ;;  %v1669_v43 = vadd.f32 1.0, %v2410_v46  ;;  %v1497_v47 = vpop.f32.mrb[58].mxu0 }
 0x4b4   : > { %2421 = vpow2.f32 %v2126_v37  ;;  %v1545_v49 = vadd.f32 %v3423_v23, %v1493_v40  ;;  %1844 = vperm.xlu1 %2318, %v2412_v57   ;;  %v1499_v2 = vpop.f32.mrb[59].mxu0 }
 0x4b5   : > { %2423 = vrcp.f32 %v1669_v43  ;;  %v1272_v53 = vpop.f32.mrb[58].mxu1 }
 0x4b6   : > { %v2414_v54 = vpop.eup %2413  ;;  %v2127_v59 = vmul.f32 -1.442695, %v1545_v49  ;;  %v1498_v32 = vadd.f32 %v1497_v47, %v1272_v53  ;;  %v1274_v8 = vpop.f32.mrb[59].mxu1 }
 0x4b7   : > { %v2416_v63 = vpop.eup %2415  ;;  %v1670_v4 = vadd.f32 1.0, %v2414_v54  ;;  %v1502_v22 = vpop.f32.mrb[60].mxu0 }
 0x4b8   : > { %2425 = vpow2.f32 %v2127_v59  ;;  %v1546_v17 = vadd.f32 %v3423_v23, %v1498_v32  ;;  %1849 = vperm.xlu0 %2317, %v2416_v63   ;;  %v1504_v51 = vpop.f32.mrb[61].mxu0 }
 0x4b9   : > { %2427 = vrcp.f32 %v1670_v4  ;;  %v1277_v19 = vpop.f32.mrb[60].mxu1 }
 0x4ba   : > { %v2418_v6 = vpop.eup %2417  ;;  %v2128_v11 = vmul.f32 -1.442695, %v1546_v17  ;;  %v1503_v12 = vadd.f32 %v1502_v22, %v1277_v19  ;;  %v1279_v28 = vpop.f32.mrb[61].mxu1 }
 0x4bb   : > { %v2420_v16 = vpop.eup %2419  ;;  %v1671_v27 = vadd.f32 1.0, %v2418_v6  ;;  %v1507_v0 = vpop.f32.mrb[62].mxu0 }
 0x4bc   : > { %2429 = vpow2.f32 %v2128_v11  ;;  %v1547_v39 = vadd.f32 %v3423_v23, %v1503_v12  ;;  %1854 = vperm.xlu1 %2318, %v2420_v16   ;;  %v1509_v31 = vpop.f32.mrb[63].mxu0 }
 0x4bd   : > { %2431 = vrcp.f32 %v1671_v27  ;;  %v1282_v33 = vpop.f32.mrb[62].mxu1 }
 0x4be   : > { %v2422_v35 = vpop.eup %2421  ;;  %v2129_v46 = vmul.f32 -1.442695, %v1547_v39  ;;  %v1508_v37 = vadd.f32 %v1507_v0, %v1282_v33  ;;  %v1284_v40 = vpop.f32.mrb[63].mxu1 }
 0x4bf   : > { %v2424_v41 = vpop.eup %2423  ;;  %v1672_v57 = vadd.f32 1.0, %v2422_v35  ;;  %v1512_v43 = vpop.f32.mrb[64].mxu0 }
 0x4c0   : > { %2433 = vpow2.f32 %v2129_v46  ;;  %v1548_v47 = vadd.f32 %v3423_v23, %v1508_v37  ;;  %1859 = vperm.xlu0 %2317, %v2424_v41   ;;  %v1514_v49 = vpop.f32.mrb[65].mxu0 }
 0x4c1   : > { %2435 = vrcp.f32 %v1672_v57  ;;  %v1287_v2 = vpop.f32.mrb[64].mxu1 }
 0x4c2   : > { %v2426_v53 = vpop.eup %2425  ;;  %v2130_v54 = vmul.f32 -1.442695, %v1548_v47  ;;  %v1513_v59 = vadd.f32 %v1512_v43, %v1287_v2  ;;  %v1289_v32 = vpop.f32.mrb[65].mxu1 }
 0x4c3   : > { %v2428_v8 = vpop.eup %2427  ;;  %v1673_v63 = vadd.f32 1.0, %v2426_v53 }
 0x4c4   : > { %2437 = vpow2.f32 %v2130_v54  ;;  %v1549_v4 = vadd.f32 %v3423_v23, %v1513_v59  ;;  %1864 = vperm.xlu1 %2318, %v2428_v8  }
 0x4c5   : > { %2439 = vrcp.f32 %v1673_v63 }
 0x4c6   : > { %v2430_v22 = vpop.eup %2429  ;;  %v2131_v17 = vmul.f32 -1.442695, %v1549_v4 }
 0x4c7   : > { %v2432_v51 = vpop.eup %2431  ;;  %v1674_v19 = vadd.f32 1.0, %v2430_v22 }
 0x4c8   : > { %2441 = vpow2.f32 %v2131_v17  ;;  %1869 = vperm.xlu0 %2317, %v2432_v51  }
 0x4c9   : > { %2443 = vrcp.f32 %v1674_v19 }
 0x4ca   : > { %v2434_v6 = vpop.eup %2433 }
 0x4cb   : > { %v2436_v11 = vpop.eup %2435  ;;  %v1675_v12 = vadd.f32 1.0, %v2434_v6 }
 0x4cc   : > { %1874 = vperm.xlu1 %2318, %v2436_v11  }
 0x4cd   : > { %2445 = vrcp.f32 %v1675_v12 }
 0x4ce   : > { %v2438_v28 = vpop.eup %2437 }
 0x4cf   : > { %v2440_v16 = vpop.eup %2439  ;;  %v1676_v27 = vadd.f32 1.0, %v2438_v28 }
 0x4d0   : > { %1879 = vperm.xlu0 %2317, %v2440_v16  }
 0x4d1   : > { %2447 = vrcp.f32 %v1676_v27 }
 0x4d2   : > { %v2442_v23 = vpop.eup %2441 }
 0x4d3   : > { %v2444_v0 = vpop.eup %2443  ;;  %v1677_v39 = vadd.f32 1.0, %v2442_v23 }
 0x4d4   : > { %1884 = vperm.xlu1 %2318, %v2444_v0  }
 0x4d5   : > { %2449 = vrcp.f32 %v1677_v39 }
 0x4d7   : > { %v2446_v31 = vpop.eup %2445 }
 0x4d8   : > { %1889 = vperm.xlu0 %2317, %v2446_v31  }
 0x4db   : > { %v2448_v33 = vpop.eup %2447 }
 0x4dc   : > { %1894 = vperm.xlu1 %2318, %v2448_v33  }
 0x4df   : > { %v2450_v35 = vpop.eup %2449 }
 0x4e0   : > { %1899 = vperm.xlu0 %2317, %v2450_v35  }
 0x4e3   : > { %v1745_v43 = vpop.permute.xlu0 %1744 }
 0x4e4   : > { %v1902_v2 = vmul.f32 %v1745_v43, %v2947_v52 }
 0x4e6   : > { %v1934_v8 = vsel %vm351_vm1, %v1902_v2, 0.0 }
 0x4e7   : > { %v1750_v46 = vpop.permute.xlu1 %1749 }
 0x4e8   : > { %v1903_v49 = vmul.f32 %v1750_v46, %v2955_v56 }
 0x4ea   : > { %v1935_v54 = vsel %vm351_vm1, %v1903_v49, 0.0 }
 0x4eb   : > { %v1755_v37 = vpop.permute.xlu1 %1754  ;;  %v1936_v22 = vadd.f32 %v1935_v54, %v1934_v8 }
 0x4ec   : > { %v1904_v53 = vmul.f32 %v1755_v37, %v2967_v62 }
 0x4ee   : > { %v1937_v63 = vsel %vm351_vm1, %v1904_v53, 0.0 }
 0x4ef   : > { %v1760_v40 = vpop.permute.xlu1 %1759  ;;  %v1938_v51 = vadd.f32 %v1937_v63, %v1936_v22 }
 0x4f0   : > { %v1905_v59 = vmul.f32 %v1760_v40, %v2963_v7 }
 0x4f2   : > { %v1939_v17 = vsel %vm351_vm1, %v1905_v59, 0.0 }
 0x4f3   : > { %v1765_v41 = vpop.permute.xlu1 %1764  ;;  %v1940_v19 = vadd.f32 %v1939_v17, %v1938_v51 }
 0x4f4   : > { %v1906_v4 = vmul.f32 %v1765_v41, %v2983_v5 }
 0x4f6   : > { %v1941_v52 = vsel %vm351_vm1, %v1906_v4, 0.0 }
 0x4f7   : > { %v1770_v57 = vpop.permute.xlu1 %1769  ;;  %v1942_v12 = vadd.f32 %v1941_v52, %v1940_v19 }
 0x4f8   : > { %v1907_v56 = vmul.f32 %v1770_v57, %v2979_v9 }
 0x4fa   : > { %v1943_v7 = vsel %vm351_vm1, %v1907_v56, 0.0 }
 0x4fb   : > { %v1775_v47 = vpop.permute.xlu1 %1774  ;;  %v1944_v27 = vadd.f32 %v1943_v7, %v1942_v12 }
 0x4fc   : > { %v1908_v62 = vmul.f32 %v1775_v47, %v2999_v13 }
 0x4fe   : > { %v1945_v5 = vsel %vm351_vm1, %v1908_v62, 0.0 }
 0x4ff   : > { %v1780_v32 = vpop.permute.xlu1 %1779  ;;  %v1946_v39 = vadd.f32 %v1945_v5, %v1944_v27 }
 0x500   : > { %v1909_v11 = vmul.f32 %v1780_v32, %v2995_v14 }
 0x502   : > { %v1947_v9 = vsel %vm351_vm1, %v1909_v11, 0.0 }
 0x503   : > { %v1785_v6 = vpop.permute.xlu1 %1784  ;;  %v1948_v35 = vadd.f32 %v1947_v9, %v1946_v39 }
 0x504   : > { %v1910_v16 = vmul.f32 %v1785_v6, %v3015_v29 }
 0x506   : > { %v1949_v31 = vsel %vm351_vm1, %v1910_v16, 0.0 }
 0x507   : > { %v1790_v28 = vpop.permute.xlu0 %1789  ;;  %v1950_v40 = vadd.f32 %v1949_v31, %v1948_v35 }
 0x508   : > { %v1911_v0 = vmul.f32 %v1790_v28, %v3011_v21 }
 0x50a   : > { %v1951_v46 = vsel %vm351_vm1, %v1911_v0, 0.0 }
 0x50b   : > { %v1795_v23 = vpop.permute.xlu1 %1794  ;;  %v1952_v43 = vadd.f32 %v1951_v46, %v1950_v40 }
 0x50c   : > { %v1912_v33 = vmul.f32 %v1795_v23, %v3031_v36 }
 0x50e   : > { %v1953_v41 = vsel %vm351_vm1, %v1912_v33, 0.0 }
 0x50f   : > { %v1800_v13 = vpop.permute.xlu0 %1799  ;;  %v1954_v2 = vadd.f32 %v1953_v41, %v1952_v43 }
 0x510   : > { %v1913_v37 = vmul.f32 %v1800_v13, %v3027_v26 }
 0x512   : > { %v1955_v47 = vsel %vm351_vm1, %v1913_v37, 0.0 }
 0x513   : > { %v1805_v14 = vpop.permute.xlu1 %1804  ;;  %v1956_v59 = vadd.f32 %v1955_v47, %v1954_v2 }
 0x514   : > { %v1914_v57 = vmul.f32 %v1805_v14, %v3047_v42 }
 0x516   : > { %v1957_v53 = vsel %vm351_vm1, %v1914_v57, 0.0 }
 0x517   : > { %v1810_v29 = vpop.permute.xlu0 %1809  ;;  %v1958_v63 = vadd.f32 %v1957_v53, %v1956_v59 }
 0x518   : > { %v1915_v49 = vmul.f32 %v1810_v29, %v3043_v34 }
 0x51a   : > { %v1959_v32 = vsel %vm351_vm1, %v1915_v49, 0.0 }
 0x51b   : > { %v1815_v21 = vpop.permute.xlu1 %1814  ;;  %v1960_v17 = vadd.f32 %v1959_v32, %v1958_v63 }
 0x51c   : > { %v1916_v54 = vmul.f32 %v1815_v21, %v3063_v50 }
 0x51e   : > { %v1961_v4 = vsel %vm351_vm1, %v1916_v54, 0.0 }
 0x51f   : > { %v1820_v36 = vpop.permute.xlu0 %1819  ;;  %v1962_v52 = vadd.f32 %v1961_v4, %v1960_v17 }
 0x520   : > { %v1917_v8 = vmul.f32 %v1820_v36, %v3059_v48 }
 0x522   : > { %v1963_v56 = vsel %vm351_vm1, %v1917_v8, 0.0 }
 0x523   : > { %v1825_v26 = vpop.permute.xlu1 %1824  ;;  %v1964_v6 = vadd.f32 %v1963_v56, %v1962_v52 }
 0x524   : > { %v1918_v22 = vmul.f32 %v1825_v26, %v3079_v60 }
 0x526   : > { %v1965_v62 = vsel %vm351_vm1, %v1918_v22, 0.0 }
 0x527   : > { %v1830_v42 = vpop.permute.xlu0 %1829  ;;  %v1966_v12 = vadd.f32 %v1965_v62, %v1964_v6 }
 0x528   : > { %v1919_v51 = vmul.f32 %v1830_v42, %v3075_v61 }
 0x52a   : > { %v1967_v7 = vsel %vm351_vm1, %v1919_v51, 0.0 }
 0x52b   : > { %v1835_v34 = vpop.permute.xlu1 %1834  ;;  %v1968_v16 = vadd.f32 %v1967_v7, %v1966_v12 }
 0x52c   : > { %v1920_v19 = vmul.f32 %v1835_v34, %v3095_v10 }
 0x52e   : > { %v1969_v28 = vsel %vm351_vm1, %v1920_v19, 0.0 }
 0x52f   : > { %v1840_v50 = vpop.permute.xlu0 %1839  ;;  %v1970_v9 = vadd.f32 %v1969_v28, %v1968_v16 }
 0x530   : > { %v1921_v11 = vmul.f32 %v1840_v50, %v3091_v15 }
 0x532   : > { %v1971_v27 = vsel %vm351_vm1, %v1921_v11, 0.0 }
 0x533   : > { %v1845_v48 = vpop.permute.xlu1 %1844  ;;  %v1972_v13 = vadd.f32 %v1971_v27, %v1970_v9 }
 0x534   : > { %v1922_v5 = vmul.f32 %v1845_v48, %v3111_v18 }
 0x536   : > { %v1973_v0 = vsel %vm351_vm1, %v1922_v5, 0.0 }
 0x537   : > { %v1850_v60 = vpop.permute.xlu0 %1849  ;;  %v1974_v35 = vadd.f32 %v1973_v0, %v1972_v13 }
 0x538   : > { %v1923_v23 = vmul.f32 %v1850_v60, %v3107_v20 }
 0x53a   : > { %v1975_v31 = vsel %vm351_vm1, %v1923_v23, 0.0 }
 0x53b   : > { %v1855_v61 = vpop.permute.xlu1 %1854  ;;  %v1976_v37 = vadd.f32 %v1975_v31, %v1974_v35 }
 0x53c   : > { %v1924_v39 = vmul.f32 %v1855_v61, %v3127_v24 }
 0x53e   : > { %v1977_v14 = vsel %vm351_vm1, %v1924_v39, 0.0 }
 0x53f   : > { %v1860_v10 = vpop.permute.xlu0 %1859  ;;  %v1978_v41 = vadd.f32 %v1977_v14, %v1976_v37 }
 0x540   : > { %v1925_v33 = vmul.f32 %v1860_v10, %v3123_v38 }
 0x542   : > { %v1979_v40 = vsel %vm351_vm1, %v1925_v33, 0.0 }
 0x543   : > { %v1865_v15 = vpop.permute.xlu1 %1864  ;;  %v1980_v21 = vadd.f32 %v1979_v40, %v1978_v41 }
 0x544   : > { %v1926_v46 = vmul.f32 %v1865_v15, %v3143_v30 }
 0x546   : > { %v1981_v57 = vsel %vm351_vm1, %v1926_v46, 0.0 }
 0x547   : > { %v1870_v18 = vpop.permute.xlu0 %1869  ;;  %v1982_v2 = vadd.f32 %v1981_v57, %v1980_v21 }
 0x548   : > { %v1927_v29 = vmul.f32 %v1870_v18, %v3139_v45 }
 0x54a   : > { %v1983_v47 = vsel %vm351_vm1, %v1927_v29, 0.0 }
 0x54b   : > { %v1875_v20 = vpop.permute.xlu1 %1874  ;;  %v1984_v53 = vadd.f32 %v1983_v47, %v1982_v2 }
 0x54c   : > { %v1928_v43 = vmul.f32 %v1875_v20, %v3159_v44 }
 0x54e   : > { %v1985_v30 = vsel %vm351_vm1, %v1928_v43, 0.0 }
 0x54f   : > { %v1880_v24 = vpop.permute.xlu0 %1879  ;;  %v1986_v26 = vadd.f32 %v1985_v30, %v1984_v53 }
 0x550   : > { %v1929_v49 = vmul.f32 %v1880_v24, %v3155_v55 }
 0x552   : > { %v1987_v45 = vsel %vm351_vm1, %v1929_v49, 0.0 }
 0x553   : > { %v1885_v38 = vpop.permute.xlu1 %1884  ;;  %v1988_v32 = vadd.f32 %v1987_v45, %v1986_v26 }
 0x554   : > { %v1930_v36 = vmul.f32 %v1885_v38, %v3175_v58 }
 0x556   : > { %v1989_v44 = vsel %vm351_vm1, %v1930_v36, 0.0 }
 0x557   : > { %v1890_v54 = vpop.permute.xlu0 %1889  ;;  %v1990_v42 = vadd.f32 %v1989_v44, %v1988_v32 }
 0x558   : > { %v1931_v59 = vmul.f32 %v1890_v54, %v3171_v1 }
 0x55a   : > { %v1991_v63 = vsel %vm351_vm1, %v1931_v59, 0.0 }
 0x55b   : > { %v1895_v8 = vpop.permute.xlu1 %1894  ;;  %v1992_v4 = vadd.f32 %v1991_v63, %v1990_v42 }
 0x55c   : > { %v1932_v55 = vmul.f32 %v1895_v8, %v3191_v3 }
 0x55e   : > { %v1993_v58 = vsel %vm351_vm1, %v1932_v55, 0.0 }
 0x55f   : > { %v1900_v22 = vpop.permute.xlu0 %1899  ;;  %v1994_v34 = vadd.f32 %v1993_v58, %v1992_v4 }
 0x560   : > { %v1933_v17 = vmul.f32 %v1900_v22, %v3187_v25 }
 0x562   : > { %v1995_v1 = vsel %vm351_vm1, %v1933_v17, 0.0 }
 0x563   : > { %v1996_v56 = vadd.f32 %v1995_v1, %v1994_v34 }
 0x565   : > { %v1997_v51 = vrot.slane %v1996_v56, 4 }
 0x567   : > { %v1998_v52 = vadd.f32 %v1997_v51, %v1996_v56 }
 0x569   : > { %v1999_v50 = vrot.slane %v1998_v52, 2 }
 0x56b   : > { %v2000_v62 = vadd.f32 %v1999_v50, %v1998_v52 }
 0x56d   : > { %v2001_v19 = vrot.slane %v2000_v62, 1 }
 0x56f   : > { %v2002_v3 = vadd.f32 %v2001_v19, %v2000_v62 }
 0x571   : > { %v2003_v6 = vmul.f32 0.00390625, %v2002_v3 }
 0x573   : > { %2005 = vst.msk [vmem:[%s313_s13] sm:$0x1] %vm2004_vm6, %v2003_v6 }
 0x574   : > { %2492 = shalt.err (!%p2489_p7)
}
 0x575   : > { %s2493_s25 = scalar_lea.hbm %s3526_s21, 16  ;;  %s2497_s28 = scalar_lea.hbm %s3576_s8, 32 }
 0x576   : > { %p2494_p8 = scmp.ne.s32.totalorder %s3526_s21, %s2493_s25  ;;  %p2498_p1 = scmp.lt.u32.totalorder %s3526_s21, %s3576_s8 }
 0x577   : > { %p2499_p0 = scmp.lt.u32.totalorder %s2497_s28, %s2493_s25  ;;  %p2501_p6 = scmp.lt.u32.totalorder %s2493_s25, %s3526_s21 }
 0x578   : > { %p2495_p11 = pnand %p2494_p8, %p3587_p9 }
 0x579   : > { %p2500_p5 = por %p2499_p0, %p2498_p1 }
 0x57a   : > { %p2496_p13 = pneg %p2495_p11 }
 0x57b   : > { %p2502_p10 = por %p2501_p6, %p2500_p5 }
 0x57d   : > { %p2503_p12 = pnand %p2502_p10, %p2496_p13 }
 0x57f   : > { %2506 = shalt.err (!%p2503_p12)
}
 0x580   : > { %2265 = dma.vmem_to_hbm [thread:$0]  (%p3587_p9), %s3528_s14, 16, %s3526_s21, %s2007_s18  }
 0x581 PF: > { %p2277_p2 = scmp.ge.s32.totalorder %s2545_s10, 2  ;;  %s2031_s19 = sand.u32 1, %s2533_s29  }
 0x582   : > { %p3588_p3 = scmp.ne.s32.totalorder %s3581_s17, 0  ;;  %s2032_s22 = scalar_lea.sflag [#allocation5], %s2031_s19 }
 0x584   : > { %p2272_p4 = pnand %p2277_p2, %p3588_p3 }
 0x586   : > { %2528 = dma.done.wait (!%p2272_p4), %s2032_s22, 16  }
 0x587   : > { %2530 = vsyncadd (!%p2272_p4), %s2032_s22, 4294967280  ;;  %p20_p7 = scmp.ge.s32.totalorder %s2628_s12, 4   ;;  %s3589_s29 = smov %s2537_s30 }
 0x588   : > { %s3590_s30 = smov %s2541_s9  ;;  %s3591_s9 = smov %s2639_s15 }
 0x589   : > { %s3592_s10 = smov %s2628_s12  ;;  %22 = sbr.rel (!%p20_p7) target bundleno = 6 (0x6), region = 92 }
 0x590   :  { %2036 = vsyncpa [#allocation4], 1 }
 0x591   :  { %2038 = vsyncpa [#allocation4 + $0x1], 1 }
 0x592   :  { %2039 = vsyncpa [#allocation5], 1 }
 0x593   :  { %2041 = vsyncpa [#allocation5 + $0x1], 1 }

</bundles_post_ra>
